<compile_context>
chip_gen: v7x
topology: tpu7x:2x2x1
jax: 0.10.0
libtpu: 0.0.40
codegen_flags: <defaults>
</compile_context>

<pallas_src>
import functools
import math

import jax
import jax.numpy as jnp
from jax import lax
from jax.experimental import pallas as pl
from jax.experimental.pallas import tpu as pltpu


# ----------------------------------------------------------------------------
# Shared math helpers (used by both the kernel and the pure-JAX reference)
# ----------------------------------------------------------------------------
_GELU_C = math.sqrt(2.0 / math.pi)


def _gelu_tanh(x):
    # tanh-approximate GELU (<=~3e-4 abs deviation from the exact erf GELU); tanh runs
    # on the EUP so it overlaps with MXU matmuls instead of burning VALU slots.
    return 0.5 * x * (1.0 + jnp.tanh(_GELU_C * (x + 0.044715 * (x * x * x))))


def _layer_norm(y, g, b, eps=1e-5):
    mu = jnp.mean(y, axis=-1, keepdims=True)
    var = jnp.mean((y - mu) ** 2, axis=-1, keepdims=True)
    return (y - mu) * lax.rsqrt(var + eps) * g + b


def positional_encoding(C, E, norm=10000.0, dtype=jnp.float32):
    # PositionalEncoding.forward: sin(pos @ freq + sin_offset)
    index = jnp.arange(E)
    k = jnp.repeat(jnp.arange(E // 2), 2)                      # [0,0,1,1,...]
    freq = (norm ** (-2.0 * k / E)).astype(dtype)              # (E,)
    sin_offset = ((index % 2 == 0) * (math.pi / 2)).astype(dtype)
    pos = jnp.arange(C, dtype=dtype)[:, None]                  # (C, 1)
    return jnp.sin(pos * freq[None, :] + sin_offset[None, :])  # (C, E)


# ----------------------------------------------------------------------------
# Weight packing (XLA side, negligible cost): stack per-layer weights, fuse the
# q/k/v matrices into one (E, 3E) block, cast matmul weights to bf16.
# ----------------------------------------------------------------------------
def pack_params(params):
    blocks = params["blocks"]
    bf16 = jnp.bfloat16
    stack = lambda name: jnp.stack([blk[name] for blk in blocks])
    wqkv = jnp.concatenate([stack("wq"), stack("wk"), stack("wv")], axis=-1)  # (L,E,3E)
    return {
        "wqkv": wqkv.astype(bf16),                              # (L, E, 3E) bf16
        "wproj": stack("wproj").astype(bf16),                   # (L, E, E)  bf16
        "ln1_g": stack("ln1_g"), "ln1_b": stack("ln1_b"),       # (L, 1, E)  f32
        "ln2_g": stack("ln2_g"), "ln2_b": stack("ln2_b"),
        "w1": stack("w1").astype(bf16), "b1": stack("b1"),      # (L, E, Fh) / (L, 1, Fh)
        "w2": stack("w2").astype(bf16), "b2": stack("b2"),      # (L, Fh, E) / (L, 1, E)
    }


# ----------------------------------------------------------------------------
# Pallas kernel: one TransformerBlock per grid step, activation resident in the
# output block across the layer axis.
# ----------------------------------------------------------------------------
def geppetto_layer_kernel(x_ref, keep_ref, causal_ref,
                          ln1g_ref, ln1b_ref, wqkv_ref, wproj_ref,
                          ln2g_ref, ln2b_ref,
                          w1_ref, b1_ref, w2_ref, b2_ref,
                          out_ref, *, n_heads, batch, ctx):
    l = pl.program_id(0)
    M, E = out_ref.shape                   # M = batch * ctx (flattened tokens)
    H, B, C = n_heads, batch, ctx
    Hd = E // H
    bf16, f32 = jnp.bfloat16, jnp.float32
    scale = C ** (-0.5)                    # matches the PyTorch source: seq_len**-0.5

    # Seed the resident activation from the input on the first layer.
    @pl.when(l == 0)
    def _():
        out_ref[...] = x_ref[...]

    x = out_ref[...]                       # (M, E) f32 carried across grid steps
    keep = keep_ref[...]                   # (M, 1) f32: 1.0 real token, 0.0 padding
    causal = causal_ref[...]               # (C, C) f32 additive causal bias

    # ---------------- attention ----------------
    a = _layer_norm(x, ln1g_ref[0], ln1b_ref[0]).astype(bf16)          # (M, E)
    qkv = jnp.dot(a, wqkv_ref[0], preferred_element_type=f32)          # (M, 3E) one MXU matmul

    head_outs = []
    for h in range(H):                     # static unroll over heads (per-head softmax)
        q = qkv[:, h * Hd:(h + 1) * Hd] * scale
        k = qkv[:, E + h * Hd:E + (h + 1) * Hd]
        v = qkv[:, 2 * E + h * Hd:2 * E + (h + 1) * Hd]
        qh = q.reshape(B, C, Hd).astype(bf16)
        kh = k.reshape(B, C, Hd).astype(bf16)
        vh = v.reshape(B, C, Hd).astype(bf16)

        s = jnp.einsum("bqd,bkd->bqk", qh, kh,
                       preferred_element_type=f32) + causal[None]      # (B, C, C)
        s = s - jnp.max(s, axis=-1, keepdims=True)
        e = jnp.exp(s)
        p = e * pl.reciprocal(jnp.sum(e, axis=-1, keepdims=True), approx=True)

        o = jnp.einsum("bqk,bkd->bqd", p.astype(bf16), vh,
                       preferred_element_type=f32)                     # (B, C, Hd)
        head_outs.append(o.reshape(M, Hd))

    o_cat = jnp.concatenate(head_outs, axis=-1).astype(bf16)           # (M, E)
    att = jnp.dot(o_cat, wproj_ref[0], preferred_element_type=f32)     # (M, E) one matmul
    # The reference zeroes padded-query rows of each softmax matrix; since the
    # projection has no bias this is equivalent to zeroing the projected rows once.
    x = x + att * keep

    # ---------------- MLP ----------------
    m = _layer_norm(x, ln2g_ref[0], ln2b_ref[0]).astype(bf16)
    h1 = jnp.dot(m, w1_ref[0], preferred_element_type=f32) + b1_ref[0]      # (M, Fh)
    h1 = _gelu_tanh(h1)
    h2 = jnp.dot(h1.astype(bf16), w2_ref[0], preferred_element_type=f32) + b2_ref[0]
    x = x + h2

    out_ref[...] = x                       # carry to next layer / final writeback


# ----------------------------------------------------------------------------
# Full Geppetto forward (glue in plain JAX, all blocks in one pipelined Pallas call)
# ----------------------------------------------------------------------------
def geppetto_forward(tokens, params):
    packed = pack_params(params)
    zero_mask = tokens < 0
    tok = jnp.where(zero_mask, 0, tokens)                 # x * (~zero_mask)
    x = params["embedding"][tok]                          # (B, C, E)  gather left to XLA
    B, C, E = x.shape
    x = x + positional_encoding(C, E)[None, :, :].astype(x.dtype)

    H = params["n_heads"]
    L = len(params["blocks"])
    Fh = params["blocks"][0]["w1"].shape[1]
    M = B * C

    x2 = x.reshape(M, E).astype(jnp.float32)              # flatten tokens in the wrapper
    keep = (~zero_mask).reshape(M, 1).astype(jnp.float32)
    row = jnp.arange(C)[:, None]
    col = jnp.arange(C)[None, :]
    causal_bias = jnp.where(col <= row, 0.0, -1e30).astype(jnp.float32)   # (C, C)

    kern = functools.partial(geppetto_layer_kernel, n_heads=H, batch=B, ctx=C)

    def const(shape):                                     # resident across all layers
        zeros = (0,) * len(shape)
        return pl.BlockSpec(shape, lambda l, _z=zeros: _z)

    def per_layer(shape):                                 # one layer's slab per grid step
        zeros = (0,) * len(shape)
        return pl.BlockSpec((1,) + shape, lambda l, _z=zeros: (l,) + _z)

    out = pl.pallas_call(
        kern,
        out_shape=jax.ShapeDtypeStruct((M, E), jnp.float32),
        grid_spec=pltpu.PrefetchScalarGridSpec(
            num_scalar_prefetch=0,
            grid=(L,),
            in_specs=[
                const((M, E)), const((M, 1)), const((C, C)),
                per_layer((1, E)), per_layer((1, E)),          # ln1 gamma / beta
                per_layer((E, 3 * E)), per_layer((E, E)),      # fused qkv / proj
                per_layer((1, E)), per_layer((1, E)),          # ln2 gamma / beta
                per_layer((E, Fh)), per_layer((1, Fh)),        # mlp w1 / b1
                per_layer((Fh, E)), per_layer((1, E)),         # mlp w2 / b2
            ],
            out_specs=const((M, E)),
        ),
        compiler_params=pltpu.CompilerParams(
            dimension_semantics=("arbitrary",),                # layers are sequential
            vmem_limit_bytes=64 * 1024 * 1024),
    )(x2, keep, causal_bias,
      packed["ln1_g"], packed["ln1_b"], packed["wqkv"], packed["wproj"],
      packed["ln2_g"], packed["ln2_b"],
      packed["w1"], packed["b1"], packed["w2"], packed["b2"])

    return out.reshape(B, C, E)


# ----------------------------------------------------------------------------
# Pure-JAX reference: mirrors the PyTorch structure (per-head loop, mask on the
# softmax matrix) with the same precision policy (bf16 matmul inputs, f32 accum).
# ----------------------------------------------------------------------------
def geppetto_forward_ref(tokens, params):
    bf16 = jnp.bfloat16
    f32 = jnp.float32
    zero_mask = tokens < 0
    tok = jnp.where(zero_mask, 0, tokens)
    x = params["embedding"][tok]
    B, C, E = x.shape
    x = x + positional_encoding(C, E)[None, :, :].astype(x.dtype)

    H = params["n_heads"]
    Hd = E // H
    causal = jnp.tril(jnp.ones((C, C), bool))
    scale = C ** (-0.5)

    for blk in params["blocks"]:
        a = _layer_norm(x, blk["ln1_g"], blk["ln1_b"])
        abf = a.astype(bf16)
        att = jnp.zeros_like(x)
        for h in range(H):
            sl = slice(h * Hd, (h + 1) * Hd)
            q = jnp.einsum("bce,ed->bcd", abf, blk["wq"].astype(bf16)[:, sl],
                           preferred_element_type=f32)
            k = jnp.einsum("bce,ed->bcd", abf, blk["wk"].astype(bf16)[:, sl],
                           preferred_element_type=f32)
            v = jnp.einsum("bce,ed->bcd", abf, blk["wv"].astype(bf16)[:, sl],
                           preferred_element_type=f32)
            s = jnp.einsum("bqd,bkd->bqk", q.astype(bf16), k.astype(bf16),
                           preferred_element_type=f32) * scale
            s = jnp.where(causal[None], s, -1e30)
            p = jax.nn.softmax(s, axis=-1)
            p = jnp.where(zero_mask[:, :, None], 0.0, p)          # mask padded queries
            o = jnp.einsum("bqk,bkd->bqd", p.astype(bf16), v.astype(bf16),
                           preferred_element_type=f32)
            att = att + jnp.einsum("bcd,de->bce", o.astype(bf16),
                                   blk["wproj"].astype(bf16)[sl, :],
                                   preferred_element_type=f32)
        x = x + att
        m = _layer_norm(x, blk["ln2_g"], blk["ln2_b"])
        h1 = jnp.einsum("bce,ef->bcf", m.astype(bf16), blk["w1"].astype(bf16),
                        preferred_element_type=f32) + blk["b1"]
        h1 = _gelu_tanh(h1)
        h2 = jnp.einsum("bcf,fe->bce", h1.astype(bf16), blk["w2"].astype(bf16),
                        preferred_element_type=f32) + blk["b2"]
        x = x + h2
    return x


# ----------------------------------------------------------------------------
# Deterministic parameter init (synthetic; shapes follow the PyTorch module)
# ----------------------------------------------------------------------------
def init_params(key, *, n_vocab, n_embed, n_heads, n_layers, mlp_factor):
    E, Fh = n_embed, n_embed * mlp_factor
    keys = jax.random.split(key, 1 + n_layers)
    params = {
        "n_heads": n_heads,
        "embedding": 0.1 * jax.random.normal(keys[0], (n_vocab, E), jnp.float32),
        "blocks": [],
    }
    s = 1.0 / math.sqrt(E)
    for l in range(n_layers):
        ks = jax.random.split(keys[1 + l], 12)
        blk = {
            "wq": s * jax.random.normal(ks[0], (E, E), jnp.float32),
            "wk": s * jax.random.normal(ks[1], (E, E), jnp.float32),
            "wv": s * jax.random.normal(ks[2], (E, E), jnp.float32),
            "wproj": s * jax.random.normal(ks[3], (E, E), jnp.float32),
            "ln1_g": 1.0 + 0.05 * jax.random.normal(ks[4], (1, E), jnp.float32),
            "ln1_b": 0.05 * jax.random.normal(ks[5], (1, E), jnp.float32),
            "ln2_g": 1.0 + 0.05 * jax.random.normal(ks[6], (1, E), jnp.float32),
            "ln2_b": 0.05 * jax.random.normal(ks[7], (1, E), jnp.float32),
            "w1": s * jax.random.normal(ks[8], (E, Fh), jnp.float32),
            "b1": 0.05 * jax.random.normal(ks[9], (1, Fh), jnp.float32),
            "w2": (1.0 / math.sqrt(Fh)) * jax.random.normal(ks[10], (Fh, E), jnp.float32),
            "b2": 0.05 * jax.random.normal(ks[11], (1, E), jnp.float32),
        }
        params["blocks"].append(blk)
    return params


if __name__ == "__main__":
    B, C = 2, 8
    n_vocab, n_embed, n_heads, n_layers, mlp_factor = 64, 32, 4, 2, 4

    key = jax.random.PRNGKey(0)
    pkey, tkey = jax.random.split(key)
    params = init_params(pkey, n_vocab=n_vocab, n_embed=n_embed,
                         n_heads=n_heads, n_layers=n_layers, mlp_factor=mlp_factor)
    # include some negative token ids so the zero_mask path is exercised
    tokens = jax.random.randint(tkey, (B, C), -3, n_vocab, dtype=jnp.int32)

    out = jax.block_until_ready(geppetto_forward(tokens, params))
    ref = jax.block_until_ready(geppetto_forward_ref(tokens, params))

    assert out.shape == (B, C, n_embed), out.shape
    assert bool(jnp.all(jnp.isfinite(out)))
    err = float(jnp.max(jnp.abs(out - ref)))
    assert bool(jnp.allclose(out, ref, atol=3e-2, rtol=3e-2)), err

    print("KERNEL_OK")
</pallas_src>

<mosaic_0001>
module attributes {stable_mosaic.version = 11 : i64} {
  func.func @geppetto_layer_kernel(%arg0: i32, %arg1: memref<16x32xf32, #tpu.memory_space<vmem>>, %arg2: memref<16x1xf32, #tpu.memory_space<vmem>>, %arg3: memref<8x8xf32, #tpu.memory_space<vmem>>, %arg4: memref<1x1x32xf32, #tpu.memory_space<vmem>>, %arg5: memref<1x1x32xf32, #tpu.memory_space<vmem>>, %arg6: memref<1x32x96xbf16, #tpu.memory_space<vmem>>, %arg7: memref<1x32x32xbf16, #tpu.memory_space<vmem>>, %arg8: memref<1x1x32xf32, #tpu.memory_space<vmem>>, %arg9: memref<1x1x32xf32, #tpu.memory_space<vmem>>, %arg10: memref<1x32x128xbf16, #tpu.memory_space<vmem>>, %arg11: memref<1x1x128xf32, #tpu.memory_space<vmem>>, %arg12: memref<1x128x32xbf16, #tpu.memory_space<vmem>>, %arg13: memref<1x1x32xf32, #tpu.memory_space<vmem>>, %arg14: memref<16x32xf32, #tpu.memory_space<vmem>>) attributes {dimension_semantics = [#tpu.dimension_semantics<arbitrary>], iteration_bounds = array<i64: 2>, scalar_prefetch = 0 : i64, scratch_operands = 0 : i64, tpu.core_type = #tpu.core_type<tc>, window_params = [{pipeline_mode = #tpu.pipeline_mode<synchronous>, transform_indices = @transform_0, window_bounds = array<i64: 16, 32>}, {pipeline_mode = #tpu.pipeline_mode<synchronous>, transform_indices = @transform_1, window_bounds = array<i64: 16, 1>}, {pipeline_mode = #tpu.pipeline_mode<synchronous>, transform_indices = @transform_2, window_bounds = array<i64: 8, 8>}, {transform_indices = @transform_3, window_bounds = array<i64: 1, 1, 32>}, {transform_indices = @transform_4, window_bounds = array<i64: 1, 1, 32>}, {transform_indices = @transform_5, window_bounds = array<i64: 1, 32, 96>}, {transform_indices = @transform_6, window_bounds = array<i64: 1, 32, 32>}, {transform_indices = @transform_7, window_bounds = array<i64: 1, 1, 32>}, {transform_indices = @transform_8, window_bounds = array<i64: 1, 1, 32>}, {transform_indices = @transform_9, window_bounds = array<i64: 1, 32, 128>}, {transform_indices = @transform_10, window_bounds = array<i64: 1, 1, 128>}, {transform_indices = @transform_11, window_bounds = array<i64: 1, 128, 32>}, {transform_indices = @transform_12, window_bounds = array<i64: 1, 1, 32>}, {pipeline_mode = #tpu.pipeline_mode<synchronous>, transform_indices = @transform_13, window_bounds = array<i64: 16, 32>}]} {
    %c0_i32 = arith.constant 0 : i32
    %0 = arith.cmpi eq, %arg0, %c0_i32 : i32
    %1 = arith.extui %0 : i1 to i32
    %c0_i32_0 = arith.constant 0 : i32
    %2 = arith.cmpi ne, %1, %c0_i32_0 : i32
    scf.if %2 {
      %c0_75 = arith.constant 0 : index
      %c0_76 = arith.constant 0 : index
      %213 = vector.load %arg1[%c0_75, %c0_76] : memref<16x32xf32, #tpu.memory_space<vmem>>, vector<16x32xf32>
      %c0_77 = arith.constant 0 : index
      %c0_78 = arith.constant 0 : index
      %214 = vector.load %arg14[%c0_77, %c0_78] : memref<16x32xf32, #tpu.memory_space<vmem>>, vector<16x32xf32>
      tpu.vector_store %arg14[%c0_77, %c0_78], %213 {strides = array<i32>} : memref<16x32xf32, #tpu.memory_space<vmem>>, vector<16x32xf32>,
    } else {
    }
    %c0 = arith.constant 0 : index
    %c0_1 = arith.constant 0 : index
    %3 = vector.load %arg14[%c0, %c0_1] : memref<16x32xf32, #tpu.memory_space<vmem>>, vector<16x32xf32>
    %c0_2 = arith.constant 0 : index
    %c0_3 = arith.constant 0 : index
    %4 = vector.load %arg2[%c0_2, %c0_3] : memref<16x1xf32, #tpu.memory_space<vmem>>, vector<16x1xf32>
    %c0_4 = arith.constant 0 : index
    %c0_5 = arith.constant 0 : index
    %5 = vector.load %arg3[%c0_4, %c0_5] : memref<8x8xf32, #tpu.memory_space<vmem>>, vector<8x8xf32>
    %c0_6 = arith.constant 0 : index
    %c0_7 = arith.constant 0 : index
    %c0_8 = arith.constant 0 : index
    %6 = vector.load %arg4[%c0_6, %c0_7, %c0_8] : memref<1x1x32xf32, #tpu.memory_space<vmem>>, vector<1x1x32xf32>
    %7 = vector.shape_cast %6 : vector<1x1x32xf32> to vector<1x32xf32>
    %c0_9 = arith.constant 0 : index
    %c0_10 = arith.constant 0 : index
    %c0_11 = arith.constant 0 : index
    %8 = vector.load %arg5[%c0_9, %c0_10, %c0_11] : memref<1x1x32xf32, #tpu.memory_space<vmem>>, vector<1x1x32xf32>
    %9 = vector.shape_cast %8 : vector<1x1x32xf32> to vector<1x32xf32>
    %cst = arith.constant dense<0.000000e+00> : vector<16xf32>
    %10 = vector.multi_reduction <add>, %3, %cst [1] : vector<16x32xf32> to vector<16xf32>
    %11 = vector.shape_cast %10 : vector<16xf32> to vector<16x1xf32>
    %cst_12 = arith.constant 3.200000e+01 : f32
    %12 = vector.broadcast %cst_12 : f32 to vector<16x1xf32>
    %13 = arith.divf %11, %12 : vector<16x1xf32>
    %14 = vector.broadcast %13 : vector<16x1xf32> to vector<16x32xf32>
    %15 = arith.subf %3, %14 : vector<16x32xf32>
    %16 = arith.mulf %15, %15 : vector<16x32xf32>
    %cst_13 = arith.constant dense<0.000000e+00> : vector<16xf32>
    %17 = vector.multi_reduction <add>, %16, %cst_13 [1] : vector<16x32xf32> to vector<16xf32>
    %18 = vector.shape_cast %17 : vector<16xf32> to vector<16x1xf32>
    %cst_14 = arith.constant 3.200000e+01 : f32
    %19 = vector.broadcast %cst_14 : f32 to vector<16x1xf32>
    %20 = arith.divf %18, %19 : vector<16x1xf32>
    %21 = vector.broadcast %13 : vector<16x1xf32> to vector<16x32xf32>
    %22 = arith.subf %3, %21 : vector<16x32xf32>
    %cst_15 = arith.constant 9.99999974E-6 : f32
    %23 = vector.broadcast %cst_15 : f32 to vector<16x1xf32>
    %24 = arith.addf %20, %23 : vector<16x1xf32>
    %25 = math.rsqrt %24 : vector<16x1xf32>
    %26 = vector.broadcast %25 : vector<16x1xf32> to vector<16x32xf32>
    %27 = arith.mulf %22, %26 : vector<16x32xf32>
    %28 = vector.broadcast %7 : vector<1x32xf32> to vector<16x32xf32>
    %29 = arith.mulf %27, %28 : vector<16x32xf32>
    %30 = vector.broadcast %9 : vector<1x32xf32> to vector<16x32xf32>
    %31 = arith.addf %29, %30 : vector<16x32xf32>
    %32 = arith.truncf %31 : vector<16x32xf32> to vector<16x32xbf16>
    %c0_16 = arith.constant 0 : index
    %c0_17 = arith.constant 0 : index
    %c0_18 = arith.constant 0 : index
    %33 = vector.load %arg6[%c0_16, %c0_17, %c0_18] : memref<1x32x96xbf16, #tpu.memory_space<vmem>>, vector<1x32x96xbf16>
    %34 = vector.shape_cast %33 : vector<1x32x96xbf16> to vector<32x96xbf16>
    %cst_19 = arith.constant dense<0.000000e+00> : vector<16x96xf32>
    %35 = tpu.matmul %32, %34, %cst_19 {dimension_numbers = #tpu.dot_dimension_numbers<[1], [0], [0], [1], [0, 0, 1, 1], [], []>} : vector<16x32xbf16>, vector<32x96xbf16>, vector<16x96xf32> -> vector<16x96xf32>
    %36 = vector.extract_strided_slice %35 {offsets = [0, 0], sizes = [16, 8], strides = [1, 1]} : vector<16x96xf32> to vector<16x8xf32>
    %cst_20 = arith.constant 0.353553385 : f32
    %37 = vector.broadcast %cst_20 : f32 to vector<16x8xf32>
    %38 = arith.mulf %36, %37 : vector<16x8xf32>
    %39 = vector.extract_strided_slice %35 {offsets = [0, 32], sizes = [16, 8], strides = [1, 1]} : vector<16x96xf32> to vector<16x8xf32>
    %40 = vector.extract_strided_slice %35 {offsets = [0, 64], sizes = [16, 8], strides = [1, 1]} : vector<16x96xf32> to vector<16x8xf32>
    %41 = vector.shape_cast %38 : vector<16x8xf32> to vector<2x8x8xf32>
    %42 = arith.truncf %41 : vector<2x8x8xf32> to vector<2x8x8xbf16>
    %43 = vector.shape_cast %39 : vector<16x8xf32> to vector<2x8x8xf32>
    %44 = arith.truncf %43 : vector<2x8x8xf32> to vector<2x8x8xbf16>
    %45 = vector.shape_cast %40 : vector<16x8xf32> to vector<2x8x8xf32>
    %46 = arith.truncf %45 : vector<2x8x8xf32> to vector<2x8x8xbf16>
    "tpu.trace_start"() <{level = 10 : i32, message = "bqd,bkd->bqk"}> : () -> ()
    %cst_21 = arith.constant dense<0.000000e+00> : vector<2x8x8xf32>
    %47 = tpu.matmul %42, %44, %cst_21 {dimension_numbers = #tpu.dot_dimension_numbers<[2], [2], [1], [1], [0, 0, 0, 1, 1, 1], [0], [0]>} : vector<2x8x8xbf16>, vector<2x8x8xbf16>, vector<2x8x8xf32> -> vector<2x8x8xf32>
    "tpu.trace_stop"() : () -> ()
    %48 = vector.shape_cast %5 : vector<8x8xf32> to vector<1x8x8xf32>
    %49 = vector.broadcast %48 : vector<1x8x8xf32> to vector<2x8x8xf32>
    %50 = arith.addf %47, %49 : vector<2x8x8xf32>
    %cst_22 = arith.constant dense<0xFF800000> : vector<2x8xf32>
    %51 = vector.multi_reduction <maximumf>, %50, %cst_22 [2] : vector<2x8x8xf32> to vector<2x8xf32>
    %52 = vector.shape_cast %51 : vector<2x8xf32> to vector<2x8x1xf32>
    %53 = vector.broadcast %52 : vector<2x8x1xf32> to vector<2x8x8xf32>
    %54 = arith.subf %50, %53 : vector<2x8x8xf32>
    %55 = math.exp %54 : vector<2x8x8xf32>
    %cst_23 = arith.constant dense<0.000000e+00> : vector<2x8xf32>
    %56 = vector.multi_reduction <add>, %55, %cst_23 [2] : vector<2x8x8xf32> to vector<2x8xf32>
    %57 = vector.shape_cast %56 : vector<2x8xf32> to vector<2x8x1xf32>
    %58 = tpu.reciprocal %57 {approx = true} : vector<2x8x1xf32> -> vector<2x8x1xf32>
    %59 = vector.broadcast %58 : vector<2x8x1xf32> to vector<2x8x8xf32>
    %60 = arith.mulf %55, %59 : vector<2x8x8xf32>
    %61 = arith.truncf %60 : vector<2x8x8xf32> to vector<2x8x8xbf16>
    "tpu.trace_start"() <{level = 10 : i32, message = "bqk,bkd->bqd"}> : () -> ()
    %cst_24 = arith.constant dense<0.000000e+00> : vector<2x8x8xf32>
    %62 = tpu.matmul %61, %46, %cst_24 {dimension_numbers = #tpu.dot_dimension_numbers<[2], [1], [1], [2], [0, 0, 0, 1, 1, 2], [0], [0]>} : vector<2x8x8xbf16>, vector<2x8x8xbf16>, vector<2x8x8xf32> -> vector<2x8x8xf32>
    "tpu.trace_stop"() : () -> ()
    %63 = vector.shape_cast %62 : vector<2x8x8xf32> to vector<16x8xf32>
    %64 = vector.extract_strided_slice %35 {offsets = [0, 8], sizes = [16, 8], strides = [1, 1]} : vector<16x96xf32> to vector<16x8xf32>
    %cst_25 = arith.constant 0.353553385 : f32
    %65 = vector.broadcast %cst_25 : f32 to vector<16x8xf32>
    %66 = arith.mulf %64, %65 : vector<16x8xf32>
    %67 = vector.extract_strided_slice %35 {offsets = [0, 40], sizes = [16, 8], strides = [1, 1]} : vector<16x96xf32> to vector<16x8xf32>
    %68 = vector.extract_strided_slice %35 {offsets = [0, 72], sizes = [16, 8], strides = [1, 1]} : vector<16x96xf32> to vector<16x8xf32>
    %69 = vector.shape_cast %66 : vector<16x8xf32> to vector<2x8x8xf32>
    %70 = arith.truncf %69 : vector<2x8x8xf32> to vector<2x8x8xbf16>
    %71 = vector.shape_cast %67 : vector<16x8xf32> to vector<2x8x8xf32>
    %72 = arith.truncf %71 : vector<2x8x8xf32> to vector<2x8x8xbf16>
    %73 = vector.shape_cast %68 : vector<16x8xf32> to vector<2x8x8xf32>
    %74 = arith.truncf %73 : vector<2x8x8xf32> to vector<2x8x8xbf16>
    "tpu.trace_start"() <{level = 10 : i32, message = "bqd,bkd->bqk"}> : () -> ()
    %cst_26 = arith.constant dense<0.000000e+00> : vector<2x8x8xf32>
    %75 = tpu.matmul %70, %72, %cst_26 {dimension_numbers = #tpu.dot_dimension_numbers<[2], [2], [1], [1], [0, 0, 0, 1, 1, 1], [0], [0]>} : vector<2x8x8xbf16>, vector<2x8x8xbf16>, vector<2x8x8xf32> -> vector<2x8x8xf32>
    "tpu.trace_stop"() : () -> ()
    %76 = vector.shape_cast %5 : vector<8x8xf32> to vector<1x8x8xf32>
    %77 = vector.broadcast %76 : vector<1x8x8xf32> to vector<2x8x8xf32>
    %78 = arith.addf %75, %77 : vector<2x8x8xf32>
    %cst_27 = arith.constant dense<0xFF800000> : vector<2x8xf32>
    %79 = vector.multi_reduction <maximumf>, %78, %cst_27 [2] : vector<2x8x8xf32> to vector<2x8xf32>
    %80 = vector.shape_cast %79 : vector<2x8xf32> to vector<2x8x1xf32>
    %81 = vector.broadcast %80 : vector<2x8x1xf32> to vector<2x8x8xf32>
    %82 = arith.subf %78, %81 : vector<2x8x8xf32>
    %83 = math.exp %82 : vector<2x8x8xf32>
    %cst_28 = arith.constant dense<0.000000e+00> : vector<2x8xf32>
    %84 = vector.multi_reduction <add>, %83, %cst_28 [2] : vector<2x8x8xf32> to vector<2x8xf32>
    %85 = vector.shape_cast %84 : vector<2x8xf32> to vector<2x8x1xf32>
    %86 = tpu.reciprocal %85 {approx = true} : vector<2x8x1xf32> -> vector<2x8x1xf32>
    %87 = vector.broadcast %86 : vector<2x8x1xf32> to vector<2x8x8xf32>
    %88 = arith.mulf %83, %87 : vector<2x8x8xf32>
    %89 = arith.truncf %88 : vector<2x8x8xf32> to vector<2x8x8xbf16>
    "tpu.trace_start"() <{level = 10 : i32, message = "bqk,bkd->bqd"}> : () -> ()
    %cst_29 = arith.constant dense<0.000000e+00> : vector<2x8x8xf32>
    %90 = tpu.matmul %89, %74, %cst_29 {dimension_numbers = #tpu.dot_dimension_numbers<[2], [1], [1], [2], [0, 0, 0, 1, 1, 2], [0], [0]>} : vector<2x8x8xbf16>, vector<2x8x8xbf16>, vector<2x8x8xf32> -> vector<2x8x8xf32>
    "tpu.trace_stop"() : () -> ()
    %91 = vector.shape_cast %90 : vector<2x8x8xf32> to vector<16x8xf32>
    %92 = vector.extract_strided_slice %35 {offsets = [0, 16], sizes = [16, 8], strides = [1, 1]} : vector<16x96xf32> to vector<16x8xf32>
    %cst_30 = arith.constant 0.353553385 : f32
    %93 = vector.broadcast %cst_30 : f32 to vector<16x8xf32>
    %94 = arith.mulf %92, %93 : vector<16x8xf32>
    %95 = vector.extract_strided_slice %35 {offsets = [0, 48], sizes = [16, 8], strides = [1, 1]} : vector<16x96xf32> to vector<16x8xf32>
    %96 = vector.extract_strided_slice %35 {offsets = [0, 80], sizes = [16, 8], strides = [1, 1]} : vector<16x96xf32> to vector<16x8xf32>
    %97 = vector.shape_cast %94 : vector<16x8xf32> to vector<2x8x8xf32>
    %98 = arith.truncf %97 : vector<2x8x8xf32> to vector<2x8x8xbf16>
    %99 = vector.shape_cast %95 : vector<16x8xf32> to vector<2x8x8xf32>
    %100 = arith.truncf %99 : vector<2x8x8xf32> to vector<2x8x8xbf16>
    %101 = vector.shape_cast %96 : vector<16x8xf32> to vector<2x8x8xf32>
    %102 = arith.truncf %101 : vector<2x8x8xf32> to vector<2x8x8xbf16>
    "tpu.trace_start"() <{level = 10 : i32, message = "bqd,bkd->bqk"}> : () -> ()
    %cst_31 = arith.constant dense<0.000000e+00> : vector<2x8x8xf32>
    %103 = tpu.matmul %98, %100, %cst_31 {dimension_numbers = #tpu.dot_dimension_numbers<[2], [2], [1], [1], [0, 0, 0, 1, 1, 1], [0], [0]>} : vector<2x8x8xbf16>, vector<2x8x8xbf16>, vector<2x8x8xf32> -> vector<2x8x8xf32>
    "tpu.trace_stop"() : () -> ()
    %104 = vector.shape_cast %5 : vector<8x8xf32> to vector<1x8x8xf32>
    %105 = vector.broadcast %104 : vector<1x8x8xf32> to vector<2x8x8xf32>
    %106 = arith.addf %103, %105 : vector<2x8x8xf32>
    %cst_32 = arith.constant dense<0xFF800000> : vector<2x8xf32>
    %107 = vector.multi_reduction <maximumf>, %106, %cst_32 [2] : vector<2x8x8xf32> to vector<2x8xf32>
    %108 = vector.shape_cast %107 : vector<2x8xf32> to vector<2x8x1xf32>
    %109 = vector.broadcast %108 : vector<2x8x1xf32> to vector<2x8x8xf32>
    %110 = arith.subf %106, %109 : vector<2x8x8xf32>
    %111 = math.exp %110 : vector<2x8x8xf32>
    %cst_33 = arith.constant dense<0.000000e+00> : vector<2x8xf32>
    %112 = vector.multi_reduction <add>, %111, %cst_33 [2] : vector<2x8x8xf32> to vector<2x8xf32>
    %113 = vector.shape_cast %112 : vector<2x8xf32> to vector<2x8x1xf32>
    %114 = tpu.reciprocal %113 {approx = true} : vector<2x8x1xf32> -> vector<2x8x1xf32>
    %115 = vector.broadcast %114 : vector<2x8x1xf32> to vector<2x8x8xf32>
    %116 = arith.mulf %111, %115 : vector<2x8x8xf32>
    %117 = arith.truncf %116 : vector<2x8x8xf32> to vector<2x8x8xbf16>
    "tpu.trace_start"() <{level = 10 : i32, message = "bqk,bkd->bqd"}> : () -> ()
    %cst_34 = arith.constant dense<0.000000e+00> : vector<2x8x8xf32>
    %118 = tpu.matmul %117, %102, %cst_34 {dimension_numbers = #tpu.dot_dimension_numbers<[2], [1], [1], [2], [0, 0, 0, 1, 1, 2], [0], [0]>} : vector<2x8x8xbf16>, vector<2x8x8xbf16>, vector<2x8x8xf32> -> vector<2x8x8xf32>
    "tpu.trace_stop"() : () -> ()
    %119 = vector.shape_cast %118 : vector<2x8x8xf32> to vector<16x8xf32>
    %120 = vector.extract_strided_slice %35 {offsets = [0, 24], sizes = [16, 8], strides = [1, 1]} : vector<16x96xf32> to vector<16x8xf32>
    %cst_35 = arith.constant 0.353553385 : f32
    %121 = vector.broadcast %cst_35 : f32 to vector<16x8xf32>
    %122 = arith.mulf %120, %121 : vector<16x8xf32>
    %123 = vector.extract_strided_slice %35 {offsets = [0, 56], sizes = [16, 8], strides = [1, 1]} : vector<16x96xf32> to vector<16x8xf32>
    %124 = vector.extract_strided_slice %35 {offsets = [0, 88], sizes = [16, 8], strides = [1, 1]} : vector<16x96xf32> to vector<16x8xf32>
    %125 = vector.shape_cast %122 : vector<16x8xf32> to vector<2x8x8xf32>
    %126 = arith.truncf %125 : vector<2x8x8xf32> to vector<2x8x8xbf16>
    %127 = vector.shape_cast %123 : vector<16x8xf32> to vector<2x8x8xf32>
    %128 = arith.truncf %127 : vector<2x8x8xf32> to vector<2x8x8xbf16>
    %129 = vector.shape_cast %124 : vector<16x8xf32> to vector<2x8x8xf32>
    %130 = arith.truncf %129 : vector<2x8x8xf32> to vector<2x8x8xbf16>
    "tpu.trace_start"() <{level = 10 : i32, message = "bqd,bkd->bqk"}> : () -> ()
    %cst_36 = arith.constant dense<0.000000e+00> : vector<2x8x8xf32>
    %131 = tpu.matmul %126, %128, %cst_36 {dimension_numbers = #tpu.dot_dimension_numbers<[2], [2], [1], [1], [0, 0, 0, 1, 1, 1], [0], [0]>} : vector<2x8x8xbf16>, vector<2x8x8xbf16>, vector<2x8x8xf32> -> vector<2x8x8xf32>
    "tpu.trace_stop"() : () -> ()
    %132 = vector.shape_cast %5 : vector<8x8xf32> to vector<1x8x8xf32>
    %133 = vector.broadcast %132 : vector<1x8x8xf32> to vector<2x8x8xf32>
    %134 = arith.addf %131, %133 : vector<2x8x8xf32>
    %cst_37 = arith.constant dense<0xFF800000> : vector<2x8xf32>
    %135 = vector.multi_reduction <maximumf>, %134, %cst_37 [2] : vector<2x8x8xf32> to vector<2x8xf32>
    %136 = vector.shape_cast %135 : vector<2x8xf32> to vector<2x8x1xf32>
    %137 = vector.broadcast %136 : vector<2x8x1xf32> to vector<2x8x8xf32>
    %138 = arith.subf %134, %137 : vector<2x8x8xf32>
    %139 = math.exp %138 : vector<2x8x8xf32>
    %cst_38 = arith.constant dense<0.000000e+00> : vector<2x8xf32>
    %140 = vector.multi_reduction <add>, %139, %cst_38 [2] : vector<2x8x8xf32> to vector<2x8xf32>
    %141 = vector.shape_cast %140 : vector<2x8xf32> to vector<2x8x1xf32>
    %142 = tpu.reciprocal %141 {approx = true} : vector<2x8x1xf32> -> vector<2x8x1xf32>
    %143 = vector.broadcast %142 : vector<2x8x1xf32> to vector<2x8x8xf32>
    %144 = arith.mulf %139, %143 : vector<2x8x8xf32>
    %145 = arith.truncf %144 : vector<2x8x8xf32> to vector<2x8x8xbf16>
    "tpu.trace_start"() <{level = 10 : i32, message = "bqk,bkd->bqd"}> : () -> ()
    %cst_39 = arith.constant dense<0.000000e+00> : vector<2x8x8xf32>
    %146 = tpu.matmul %145, %130, %cst_39 {dimension_numbers = #tpu.dot_dimension_numbers<[2], [1], [1], [2], [0, 0, 0, 1, 1, 2], [0], [0]>} : vector<2x8x8xbf16>, vector<2x8x8xbf16>, vector<2x8x8xf32> -> vector<2x8x8xf32>
    "tpu.trace_stop"() : () -> ()
    %147 = vector.shape_cast %146 : vector<2x8x8xf32> to vector<16x8xf32>
    %148 = tpu.concatenate %63, %91, %119, %147 in 1 : vector<16x8xf32>, vector<16x8xf32>, vector<16x8xf32>, vector<16x8xf32> -> vector<16x32xf32>
    %149 = arith.truncf %148 : vector<16x32xf32> to vector<16x32xbf16>
    %c0_40 = arith.constant 0 : index
    %c0_41 = arith.constant 0 : index
    %c0_42 = arith.constant 0 : index
    %150 = vector.load %arg7[%c0_40, %c0_41, %c0_42] : memref<1x32x32xbf16, #tpu.memory_space<vmem>>, vector<1x32x32xbf16>
    %151 = vector.shape_cast %150 : vector<1x32x32xbf16> to vector<32x32xbf16>
    %cst_43 = arith.constant dense<0.000000e+00> : vector<16x32xf32>
    %152 = tpu.matmul %149, %151, %cst_43 {dimension_numbers = #tpu.dot_dimension_numbers<[1], [0], [0], [1], [0, 0, 1, 1], [], []>} : vector<16x32xbf16>, vector<32x32xbf16>, vector<16x32xf32> -> vector<16x32xf32>
    %153 = vector.broadcast %4 : vector<16x1xf32> to vector<16x32xf32>
    %154 = arith.mulf %152, %153 : vector<16x32xf32>
    %155 = arith.addf %3, %154 : vector<16x32xf32>
    %c0_44 = arith.constant 0 : index
    %c0_45 = arith.constant 0 : index
    %c0_46 = arith.constant 0 : index
    %156 = vector.load %arg8[%c0_44, %c0_45, %c0_46] : memref<1x1x32xf32, #tpu.memory_space<vmem>>, vector<1x1x32xf32>
    %157 = vector.shape_cast %156 : vector<1x1x32xf32> to vector<1x32xf32>
    %c0_47 = arith.constant 0 : index
    %c0_48 = arith.constant 0 : index
    %c0_49 = arith.constant 0 : index
    %158 = vector.load %arg9[%c0_47, %c0_48, %c0_49] : memref<1x1x32xf32, #tpu.memory_space<vmem>>, vector<1x1x32xf32>
    %159 = vector.shape_cast %158 : vector<1x1x32xf32> to vector<1x32xf32>
    %cst_50 = arith.constant dense<0.000000e+00> : vector<16xf32>
    %160 = vector.multi_reduction <add>, %155, %cst_50 [1] : vector<16x32xf32> to vector<16xf32>
    %161 = vector.shape_cast %160 : vector<16xf32> to vector<16x1xf32>
    %cst_51 = arith.constant 3.200000e+01 : f32
    %162 = vector.broadcast %cst_51 : f32 to vector<16x1xf32>
    %163 = arith.divf %161, %162 : vector<16x1xf32>
    %164 = vector.broadcast %163 : vector<16x1xf32> to vector<16x32xf32>
    %165 = arith.subf %155, %164 : vector<16x32xf32>
    %166 = arith.mulf %165, %165 : vector<16x32xf32>
    %cst_52 = arith.constant dense<0.000000e+00> : vector<16xf32>
    %167 = vector.multi_reduction <add>, %166, %cst_52 [1] : vector<16x32xf32> to vector<16xf32>
    %168 = vector.shape_cast %167 : vector<16xf32> to vector<16x1xf32>
    %cst_53 = arith.constant 3.200000e+01 : f32
    %169 = vector.broadcast %cst_53 : f32 to vector<16x1xf32>
    %170 = arith.divf %168, %169 : vector<16x1xf32>
    %171 = vector.broadcast %163 : vector<16x1xf32> to vector<16x32xf32>
    %172 = arith.subf %155, %171 : vector<16x32xf32>
    %cst_54 = arith.constant 9.99999974E-6 : f32
    %173 = vector.broadcast %cst_54 : f32 to vector<16x1xf32>
    %174 = arith.addf %170, %173 : vector<16x1xf32>
    %175 = math.rsqrt %174 : vector<16x1xf32>
    %176 = vector.broadcast %175 : vector<16x1xf32> to vector<16x32xf32>
    %177 = arith.mulf %172, %176 : vector<16x32xf32>
    %178 = vector.broadcast %157 : vector<1x32xf32> to vector<16x32xf32>
    %179 = arith.mulf %177, %178 : vector<16x32xf32>
    %180 = vector.broadcast %159 : vector<1x32xf32> to vector<16x32xf32>
    %181 = arith.addf %179, %180 : vector<16x32xf32>
    %182 = arith.truncf %181 : vector<16x32xf32> to vector<16x32xbf16>
    %c0_55 = arith.constant 0 : index
    %c0_56 = arith.constant 0 : index
    %c0_57 = arith.constant 0 : index
    %183 = vector.load %arg10[%c0_55, %c0_56, %c0_57] : memref<1x32x128xbf16, #tpu.memory_space<vmem>>, vector<1x32x128xbf16>
    %184 = vector.shape_cast %183 : vector<1x32x128xbf16> to vector<32x128xbf16>
    %cst_58 = arith.constant dense<0.000000e+00> : vector<16x128xf32>
    %185 = tpu.matmul %182, %184, %cst_58 {dimension_numbers = #tpu.dot_dimension_numbers<[1], [0], [0], [1], [0, 0, 1, 1], [], []>} : vector<16x32xbf16>, vector<32x128xbf16>, vector<16x128xf32> -> vector<16x128xf32>
    %c0_59 = arith.constant 0 : index
    %c0_60 = arith.constant 0 : index
    %c0_61 = arith.constant 0 : index
    %186 = vector.load %arg11[%c0_59, %c0_60, %c0_61] : memref<1x1x128xf32, #tpu.memory_space<vmem>>, vector<1x1x128xf32>
    %187 = vector.shape_cast %186 : vector<1x1x128xf32> to vector<1x128xf32>
    %188 = vector.broadcast %187 : vector<1x128xf32> to vector<16x128xf32>
    %189 = arith.addf %185, %188 : vector<16x128xf32>
    %cst_62 = arith.constant 5.000000e-01 : f32
    %190 = vector.broadcast %cst_62 : f32 to vector<16x128xf32>
    %191 = arith.mulf %190, %189 : vector<16x128xf32>
    %192 = arith.mulf %189, %189 : vector<16x128xf32>
    %193 = arith.mulf %192, %189 : vector<16x128xf32>
    %cst_63 = arith.constant 4.471500e-02 : f32
    %194 = vector.broadcast %cst_63 : f32 to vector<16x128xf32>
    %195 = arith.mulf %194, %193 : vector<16x128xf32>
    %196 = arith.addf %189, %195 : vector<16x128xf32>
    %cst_64 = arith.constant 0.797884583 : f32
    %197 = vector.broadcast %cst_64 : f32 to vector<16x128xf32>
    %198 = arith.mulf %197, %196 : vector<16x128xf32>
    %199 = math.tanh %198 : vector<16x128xf32>
    %cst_65 = arith.constant 1.000000e+00 : f32
    %200 = vector.broadcast %cst_65 : f32 to vector<16x128xf32>
    %201 = arith.addf %200, %199 : vector<16x128xf32>
    %202 = arith.mulf %191, %201 : vector<16x128xf32>
    %203 = arith.truncf %202 : vector<16x128xf32> to vector<16x128xbf16>
    %c0_66 = arith.constant 0 : index
    %c0_67 = arith.constant 0 : index
    %c0_68 = arith.constant 0 : index
    %204 = vector.load %arg12[%c0_66, %c0_67, %c0_68] : memref<1x128x32xbf16, #tpu.memory_space<vmem>>, vector<1x128x32xbf16>
    %205 = vector.shape_cast %204 : vector<1x128x32xbf16> to vector<128x32xbf16>
    %cst_69 = arith.constant dense<0.000000e+00> : vector<16x32xf32>
    %206 = tpu.matmul %203, %205, %cst_69 {dimension_numbers = #tpu.dot_dimension_numbers<[1], [0], [0], [1], [0, 0, 1, 1], [], []>} : vector<16x128xbf16>, vector<128x32xbf16>, vector<16x32xf32> -> vector<16x32xf32>
    %c0_70 = arith.constant 0 : index
    %c0_71 = arith.constant 0 : index
    %c0_72 = arith.constant 0 : index
    %207 = vector.load %arg13[%c0_70, %c0_71, %c0_72] : memref<1x1x32xf32, #tpu.memory_space<vmem>>, vector<1x1x32xf32>
    %208 = vector.shape_cast %207 : vector<1x1x32xf32> to vector<1x32xf32>
    %209 = vector.broadcast %208 : vector<1x32xf32> to vector<16x32xf32>
    %210 = arith.addf %206, %209 : vector<16x32xf32>
    %211 = arith.addf %155, %210 : vector<16x32xf32>
    %c0_73 = arith.constant 0 : index
    %c0_74 = arith.constant 0 : index
    %212 = vector.load %arg14[%c0_73, %c0_74] : memref<16x32xf32, #tpu.memory_space<vmem>>, vector<16x32xf32>
    tpu.vector_store %arg14[%c0_73, %c0_74], %211 {strides = array<i32>} : memref<16x32xf32, #tpu.memory_space<vmem>>, vector<16x32xf32>,
    return
  }
  func.func @transform_0(%arg0: i32) -> (i32, i32) {
    %c0_i32 = arith.constant 0 : i32
    %c0_i32_0 = arith.constant 0 : i32
    %c0_i32_1 = arith.constant 0 : i32
    return %c0_i32, %c0_i32_0 : i32, i32
  }
  func.func @transform_1(%arg0: i32) -> (i32, i32) {
    %c0_i32 = arith.constant 0 : i32
    %c0_i32_0 = arith.constant 0 : i32
    %c0_i32_1 = arith.constant 0 : i32
    return %c0_i32, %c0_i32_0 : i32, i32
  }
  func.func @transform_2(%arg0: i32) -> (i32, i32) {
    %c0_i32 = arith.constant 0 : i32
    %c0_i32_0 = arith.constant 0 : i32
    %c0_i32_1 = arith.constant 0 : i32
    return %c0_i32, %c0_i32_0 : i32, i32
  }
  func.func @transform_3(%arg0: i32) -> (i32, i32, i32) {
    %c0_i32 = arith.constant 0 : i32
    %c0_i32_0 = arith.constant 0 : i32
    %c0_i32_1 = arith.constant 0 : i32
    return %arg0, %c0_i32, %c0_i32_0 : i32, i32, i32
  }
  func.func @transform_4(%arg0: i32) -> (i32, i32, i32) {
    %c0_i32 = arith.constant 0 : i32
    %c0_i32_0 = arith.constant 0 : i32
    %c0_i32_1 = arith.constant 0 : i32
    return %arg0, %c0_i32, %c0_i32_0 : i32, i32, i32
  }
  func.func @transform_5(%arg0: i32) -> (i32, i32, i32) {
    %c0_i32 = arith.constant 0 : i32
    %c0_i32_0 = arith.constant 0 : i32
    %c0_i32_1 = arith.constant 0 : i32
    return %arg0, %c0_i32, %c0_i32_0 : i32, i32, i32
  }
  func.func @transform_6(%arg0: i32) -> (i32, i32, i32) {
    %c0_i32 = arith.constant 0 : i32
    %c0_i32_0 = arith.constant 0 : i32
    %c0_i32_1 = arith.constant 0 : i32
    return %arg0, %c0_i32, %c0_i32_0 : i32, i32, i32
  }
  func.func @transform_7(%arg0: i32) -> (i32, i32, i32) {
    %c0_i32 = arith.constant 0 : i32
    %c0_i32_0 = arith.constant 0 : i32
    %c0_i32_1 = arith.constant 0 : i32
    return %arg0, %c0_i32, %c0_i32_0 : i32, i32, i32
  }
  func.func @transform_8(%arg0: i32) -> (i32, i32, i32) {
    %c0_i32 = arith.constant 0 : i32
    %c0_i32_0 = arith.constant 0 : i32
    %c0_i32_1 = arith.constant 0 : i32
    return %arg0, %c0_i32, %c0_i32_0 : i32, i32, i32
  }
  func.func @transform_9(%arg0: i32) -> (i32, i32, i32) {
    %c0_i32 = arith.constant 0 : i32
    %c0_i32_0 = arith.constant 0 : i32
    %c0_i32_1 = arith.constant 0 : i32
    return %arg0, %c0_i32, %c0_i32_0 : i32, i32, i32
  }
  func.func @transform_10(%arg0: i32) -> (i32, i32, i32) {
    %c0_i32 = arith.constant 0 : i32
    %c0_i32_0 = arith.constant 0 : i32
    %c0_i32_1 = arith.constant 0 : i32
    return %arg0, %c0_i32, %c0_i32_0 : i32, i32, i32
  }
  func.func @transform_11(%arg0: i32) -> (i32, i32, i32) {
    %c0_i32 = arith.constant 0 : i32
    %c0_i32_0 = arith.constant 0 : i32
    %c0_i32_1 = arith.constant 0 : i32
    return %arg0, %c0_i32, %c0_i32_0 : i32, i32, i32
  }
  func.func @transform_12(%arg0: i32) -> (i32, i32, i32) {
    %c0_i32 = arith.constant 0 : i32
    %c0_i32_0 = arith.constant 0 : i32
    %c0_i32_1 = arith.constant 0 : i32
    return %arg0, %c0_i32, %c0_i32_0 : i32, i32, i32
  }
  func.func @transform_13(%arg0: i32) -> (i32, i32) {
    %c0_i32 = arith.constant 0 : i32
    %c0_i32_0 = arith.constant 0 : i32
    %c0_i32_1 = arith.constant 0 : i32
    return %c0_i32, %c0_i32_0 : i32, i32
  }
}

</mosaic_0001>

<bundles_post_ra>
// kernel: tpu_custom_call.1
= control target key start
LH: loop header
LB: loop body
LE: loop exit
PB: predicated region body
PF: predicated region fallthrough
CT: control target
= control target key end

     0   :  { %s4289_s0 = inlined_call_operand.hbm [shape: f32[16,32], index: 0, kind: input, shape index: {}]   ;;  %s4290_s1 = inlined_call_operand.hbm [shape: f32[16,1], index: 1, kind: input, shape index: {}]   ;;  %s4291_s2 = inlined_call_operand.hbm [shape: f32[8,8], index: 2, kind: input, shape index: {}]   ;;  %s4292_s3 = inlined_call_operand.hbm [shape: f32[2,1,32], index: 3, kind: input, shape index: {}]   ;;  %s4293_s4 = inlined_call_operand.hbm [shape: f32[2,1,32], index: 4, kind: input, shape index: {}]   ;;  %s4294_s5 = inlined_call_operand.hbm [shape: bf16[2,32,96], index: 5, kind: input, shape index: {}]   ;;  %s4295_s6 = inlined_call_operand.hbm [shape: bf16[2,32,32], index: 6, kind: input, shape index: {}]   ;;  %s4296_s7 = inlined_call_operand.hbm [shape: f32[2,1,32], index: 7, kind: input, shape index: {}]   ;;  %s4297_s8 = inlined_call_operand.hbm [shape: f32[2,1,32], index: 8, kind: input, shape index: {}]   ;;  %s4298_s9 = inlined_call_operand.hbm [shape: bf16[2,32,128], index: 9, kind: input, shape index: {}]   ;;  %s4299_s10 = inlined_call_operand.hbm [shape: f32[2,1,128], index: 10, kind: input, shape index: {}]   ;;  %s4300_s11 = inlined_call_operand.hbm [shape: bf16[2,128,32], index: 11, kind: input, shape index: {}]   ;;  %s4301_s12 = inlined_call_operand.hbm [shape: f32[2,1,32], index: 12, kind: input, shape index: {}]   ;;  %s4302_s13 = inlined_call_operand.hbm [shape: f32[16,32], index: 13, kind: output, shape index: {}]  }
   0x1   :  { %4337 = sst [smem:[#allocation39_spill]] %s4290_s1 }
   0x2   :  { %4338 = sst [smem:[#allocation40_spill]] %s4292_s3 }
   0x3   :  { %4339 = sst [smem:[#allocation41_spill]] %s4294_s5 }
   0x4   :  { %4340 = sst [smem:[#allocation42_spill]] %s4296_s7 }
   0x5   :  { %4341 = sst [smem:[#allocation43_spill]] %s4298_s9 }
   0x6   :  { %4342 = sst [smem:[#allocation44_spill]] %s4299_s10 }
   0x7   :  { %4343 = sst [smem:[#allocation45_spill]] %s4301_s12 }
   0x8   :  { %4344 = sst [smem:[#allocation46_spill]] %s4302_s13 }
   0x9   :  { %18 = vsyncpa [#allocation3], 0 }
   0xa   :  { %19 = vsyncpa [#allocation6], 0 }
   0xb   :  { %20 = vsyncpa [#allocation9], 0 }
   0xc   :  { %22 = vsyncpa [#allocation9 + $0x1], 0 }
   0xd   :  { %23 = vsyncpa [#allocation12], 0 }
   0xe   :  { %25 = vsyncpa [#allocation12 + $0x1], 0 }
   0xf   :  { %26 = vsyncpa [#allocation15], 0 }
  0x10   :  { %28 = vsyncpa [#allocation15 + $0x1], 0 }
  0x11   :  { %29 = vsyncpa [#allocation18], 0 }
  0x12   :  { %31 = vsyncpa [#allocation18 + $0x1], 0 }
  0x13   :  { %32 = vsyncpa [#allocation21], 0 }
  0x14   :  { %34 = vsyncpa [#allocation21 + $0x1], 0 }
  0x15   :  { %35 = vsyncpa [#allocation4], 0  ;;  %s3495_s25 = smov 0   ;;  %s3497_s26 = smov 0  }
  0x16   :  { %s3499_s27 = smov 0   ;;  %s3501_s28 = smov 0  }
  0x17 LB: > { %4345 = sst [smem:[#allocation32_spill]] %s3379_s26  ;;  %s3514_s29 = sadd.s32 4294967295, %s3387_s28   ;;  %s3387_s28 = sphi %s3501_s28, %s4395_s28   ;;  %s3383_s27 = sphi %s3499_s27, %s4398_s27   ;;  %s3379_s26 = sphi %s3497_s26, %s4397_s26   ;;  %s3375_s25 = sphi %s3495_s25, %s4396_s25  }
  0x18   : > { %4346 = sst [smem:[#allocation33_spill]] %s3383_s27  ;;  %s3517_s30 = sadd.s32 1, %s3387_s28  }
  0x19   : > { %4347 = sst [smem:[#allocation34_spill]] %s3514_s29  ;;  %s108_s14 = ssub.s32 %s3387_s28, %s3517_s30 }
  0x1a   : > { %4348 = sst [smem:[#allocation35_spill]] %s3517_s30  ;;  %s111_s15 = sadd.s32 1, %s3383_s27 }
  0x1b   : > { %p109_p0 = scmp.eq.s32.totalorder %s108_s14, 0  ;;  %p118_p1 = scmp.ne.s32.totalorder %s3383_s27, %s3379_s26 }
  0x1c   : > { %p119_p2 = scmp.eq.s32.totalorder %s3387_s28, 0  ;;  %p124_p3 = scmp.ne.s32.totalorder %s3379_s26, %s3375_s25 }
  0x1d   : > { %s3527_s16 = scalar_select %p109_p0, %s3383_s27, %s111_s15  }
  0x1e   : > { %p3529_p4 = por %p119_p2, %p118_p1  ;;  %p4307_p5 = scmp.eq.s32.totalorder %s3514_s29, 0 }
  0x1f   : > { %4349 = sst [smem:[#allocation36_spill]] %s3527_s16  ;;  %p2427_p6 = scmp.ge.s32.totalorder %s3387_s28, 1 }
  0x20   : > { %p390_p7 = scmp.lt.s32.totalorder %s3387_s28, 3  ;;  %p3538_p8 = por %p4307_p5, %p124_p3 }
  0x21   : > { %s3389_s20 = smov [#allocation5]   ;;  %p2776_p13 = scmp.lt.s32.totalorder %s3387_s28, 2 }
  0x22   : > { %s4351_s18 = scalar_select %p3538_p8, 1, 0 }
  0x23   : > { %p3543_p10 = pnand %p2427_p6, %p390_p7  ;;  %s415_s21 = sshll.u32 %s3389_s20, 4  ;;  %s416_s21 = int_to_ptr.vmem [resolvable:$true] %s415_s21 }
  0x24   : > { %4352 = sst [smem:[#allocation37_spill]] %s4351_s18  ;;  %s3557_s23 = sand.u32 1, %s3387_s28  }
  0x25   : > { %s4353_s19 = scalar_select %p3543_p10, 1, 0 }
  0x26   : > { %p2732_p11 = pneg %p3543_p10  ;;  %s3560_s24 = sand.u32 1, %s3383_s27  }
  0x27   : > { %4354 = sst [smem:[#allocation38_spill]] %s4353_s19  ;;  %p3564_p0 = pnand %p2776_p13, %p3529_p4 }
  0x28   : > { %p3551_p12 = pnand %p2732_p11, %p4307_p5  ;;  %s4357_s1 = sld [smem:[#allocation39_spill]] }
  0x29   : > { %s4356_s25 = scalar_select %p3564_p0, 1, 0 }
  0x2a   : > { %s4355_s22 = scalar_select %p3551_p12, 1, 0 }
  0x2b   : > { %p3576_p2 = pneg %p3551_p12 }
  0x2d   : > { %s4358_s13 = scalar_select %p3576_p2, 1, 0 }
  0x2e   : > { %s2915_s20 = scalar_lea.hbm %s4357_s1, 256 }
  0x2f   : > { %p2916_p1 = scmp.ne.s32.totalorder %s4357_s1, %s2915_s20  ;;  %p2922_p6 = scmp.lt.u32.totalorder %s2915_s20, %s4357_s1 }
  0x31   : > { %p2918_p3 = pnand %p3576_p2, %p2916_p1 }
  0x33   : > { %p2919_p4 = pneg %p2918_p3 }
  0x35   : > { %p2924_p7 = pnand %p2922_p6, %p2919_p4 }
  0x37   : > { %2927 = shalt.err (!%p2924_p7)
}
  0x38   : > { %s2928_s14 = scalar_lea.vmem %s416_s21, 256  ;;  %p2936_p5 = scmp.lt.s32.totalorder %s416_s21, %s416_s21 }
  0x39   : > { %p2929_p11 = scmp.ne.s32.totalorder %s416_s21, %s2928_s14  ;;  %p2937_p8 = scmp.lt.s32.totalorder %s2928_s14, %s2928_s14 }
  0x3b   : > { %p2931_p13 = pnand %p2929_p11, %p3576_p2  ;;  %p2938_p10 = por %p2937_p8, %p2936_p5 }
  0x3d   : > { %p2932_p9 = pneg %p2931_p13 }
  0x3f   : > { %p2939_p0 = pnand %p2938_p10, %p2932_p9 }
  0x41   : > { %2942 = shalt.err (!%p2939_p0)
}
  0x42   : > { %s4319_s30 = smov 128   ;;  %s4325_s27 = smov 8  }
  0x43   : > { %2738 = dma.hbm_to_vmem [thread:$0]  (!%p3551_p12), %s4357_s1, 256, %s416_s21, [#allocation6], %s4319_s30, %s4319_s30, %s4325_s27  }
  0x44   : > { %s3596_s20 = sshll.u32 %s3387_s28, 4  ;;  %s4359_s3 = sld [smem:[#allocation40_spill]] }
  0x45   : > { %s443_s26 = scalar_lea.vmem [#allocation8], %s3560_s24  ;;  %s4324_s19 = scalar_lea.sflag [#allocation9], %s3557_s23 }
  0x46   : > { %s450_s29 = sshll.u32 %s443_s26, 4  ;;  %p4360_p8 = scmp.ne.s32.totalorder %s4356_s25, 0  ;;  %s3605_s29 = int_to_ptr.vmem [resolvable:$true] %s450_s29 }
  0x48   : > { %p3612_p9 = pneg %p4360_p8 }
  0x4a   : > { %s3602_s18 = scalar_lea.hbm %s4359_s3, %s3596_s20  ;;  %s2948_s17 = scalar_lea.hbm %s4359_s3, 32 }
  0x4b   : > { %s2943_s12 = scalar_lea.hbm %s3602_s18, 16  ;;  %p2949_p1 = scmp.lt.u32.totalorder %s3602_s18, %s4359_s3 }
  0x4c   : > { %p2944_p5 = scmp.ne.s32.totalorder %s3602_s18, %s2943_s12  ;;  %p2950_p3 = scmp.lt.u32.totalorder %s2948_s17, %s2943_s12 }
  0x4d   : > { %s4361_s21 = scalar_select %p3612_p9, 1, 0 }
  0x4e   : > { %p2946_p10 = pnand %p3612_p9, %p2944_p5  ;;  %p2951_p4 = por %p2950_p3, %p2949_p1 }
  0x4f   : > { %p2952_p6 = scmp.lt.u32.totalorder %s2943_s12, %s3602_s18 }
  0x50   : > { %p2947_p0 = pneg %p2946_p10 }
  0x51   : > { %p2953_p7 = por %p2952_p6, %p2951_p4 }
  0x53   : > { %p2954_p11 = pnand %p2953_p7, %p2947_p0 }
  0x55   : > { %2957 = shalt.err (!%p2954_p11)
}
  0x56   : > { %s2958_s30 = scalar_lea.vmem %s3605_s29, 16  ;;  %s3392_s16 = smov [#allocation8]  }
  0x57   : > { %p2959_p13 = scmp.ne.s32.totalorder %s3605_s29, %s2958_s30  ;;  %s2963_s15 = sshll.u32 %s3392_s16, 4  ;;  %s2964_s15 = int_to_ptr.vmem [resolvable:$false] %s2963_s15 }
  0x58   : > { %s2965_s14 = scalar_lea.vmem %s2964_s15, 32  ;;  %p2966_p12 = scmp.lt.s32.totalorder %s3605_s29, %s2964_s15 }
  0x59   : > { %p2961_p5 = pnand %p2959_p13, %p3612_p9  ;;  %p2967_p2 = scmp.lt.s32.totalorder %s2965_s14, %s2958_s30 }
  0x5b   : > { %p2962_p10 = pneg %p2961_p5  ;;  %p2968_p1 = por %p2967_p2, %p2966_p12 }
  0x5d   : > { %p2969_p3 = pnand %p2968_p1, %p2962_p10 }
  0x5f   : > { %2972 = shalt.err (!%p2969_p3)
}
  0x60   : > { %2745 = dma.hbm_to_vmem [thread:$0]  (!%p4360_p8), %s3602_s18, 16, %s3605_s29, %s4324_s19  }
  0x61   : > { %s3638_s12 = sshll.u32 %s3560_s24, 4  ;;  %s3641_s17 = sshll.u32 %s3387_s28, 8 }
  0x62   : > { %s4362_s5 = sld [smem:[#allocation41_spill]]  ;;  %s478_s15 = scalar_lea.vmem [#allocation11], %s3638_s12 }
  0x63   : > { %s485_s14 = sshll.u32 %s478_s15, 4  ;;  %s4327_s29 = scalar_lea.sflag [#allocation12], %s3557_s23  ;;  %s3650_s14 = int_to_ptr.vmem [resolvable:$true] %s485_s14 }
  0x68   : > { %s3647_s16 = scalar_lea.hbm %s4362_s5, %s3641_s17  ;;  %s2978_s30 = scalar_lea.hbm %s4362_s5, 512 }
  0x69   : > { %s2973_s18 = scalar_lea.hbm %s3647_s16, 256  ;;  %p2979_p4 = scmp.lt.u32.totalorder %s3647_s16, %s4362_s5 }
  0x6a   : > { %p2974_p12 = scmp.ne.s32.totalorder %s3647_s16, %s2973_s18  ;;  %p2980_p6 = scmp.lt.u32.totalorder %s2978_s30, %s2973_s18 }
  0x6b   : > { %p2982_p11 = scmp.lt.u32.totalorder %s2973_s18, %s3647_s16 }
  0x6c   : > { %p2976_p2 = pnand %p2974_p12, %p3612_p9  ;;  %p2981_p7 = por %p2980_p6, %p2979_p4 }
  0x6e   : > { %p2977_p0 = pneg %p2976_p2  ;;  %p2983_p13 = por %p2982_p11, %p2981_p7 }
  0x70   : > { %p2984_p5 = pnand %p2983_p13, %p2977_p0 }
  0x72   : > { %2987 = shalt.err (!%p2984_p5)
}
  0x73   : > { %s2988_s15 = scalar_lea.vmem %s3650_s14, 256  ;;  %s3393_s19 = smov [#allocation11]  }
  0x74   : > { %p2989_p10 = scmp.ne.s32.totalorder %s3650_s14, %s2988_s15  ;;  %s2993_s27 = sshll.u32 %s3393_s19, 4  ;;  %s2994_s27 = int_to_ptr.vmem [resolvable:$false] %s2993_s27 }
  0x75   : > { %s2995_s1 = scalar_lea.vmem %s2994_s27, 512  ;;  %p2996_p12 = scmp.lt.s32.totalorder %s3650_s14, %s2994_s27 }
  0x76   : > { %p2991_p1 = pnand %p2989_p10, %p3612_p9  ;;  %p2997_p2 = scmp.lt.s32.totalorder %s2995_s1, %s2988_s15 }
  0x78   : > { %p2992_p3 = pneg %p2991_p1  ;;  %p2998_p4 = por %p2997_p2, %p2996_p12 }
  0x7a   : > { %p2999_p6 = pnand %p2998_p4, %p2992_p3 }
  0x7c   : > { %3002 = shalt.err (!%p2999_p6)
}
  0x7d   : > { %s4328_s18 = smov 64   ;;  %s3395_s30 = smov 4  }
  0x7e   : > { %2751 = dma.hbm_to_vmem [thread:$0]  (!%p4360_p8), %s3647_s16, 256, %s3650_s14, %s4327_s29, %s4328_s18, %s4328_s18, %s3395_s30  }
  0x7f   : > { %s4363_s7 = sld [smem:[#allocation42_spill]]  ;;  %s519_s27 = scalar_lea.vmem [#allocation14], %s3560_s24 }
  0x80   : > { %s526_s1 = sshll.u32 %s519_s27, 4  ;;  %s4331_s3 = scalar_lea.sflag [#allocation15], %s3557_s23  ;;  %s527_s1 = int_to_ptr.vmem [resolvable:$true] %s526_s1 }
  0x85   : > { %s3683_s19 = scalar_lea.hbm %s4363_s7, %s3596_s20  ;;  %s3008_s14 = scalar_lea.hbm %s4363_s7, 32 }
  0x86   : > { %s3003_s5 = scalar_lea.hbm %s3683_s19, 16  ;;  %p3009_p13 = scmp.lt.u32.totalorder %s3683_s19, %s4363_s7 }
  0x87   : > { %p3004_p0 = scmp.ne.s32.totalorder %s3683_s19, %s3003_s5  ;;  %p3010_p5 = scmp.lt.u32.totalorder %s3008_s14, %s3003_s5 }
  0x88   : > { %p3012_p1 = scmp.lt.u32.totalorder %s3003_s5, %s3683_s19 }
  0x89   : > { %p3006_p7 = pnand %p3004_p0, %p3612_p9  ;;  %p3011_p10 = por %p3010_p5, %p3009_p13 }
  0x8b   : > { %p3007_p11 = pneg %p3006_p7  ;;  %p3013_p3 = por %p3012_p1, %p3011_p10 }
  0x8d   : > { %p3014_p12 = pnand %p3013_p3, %p3007_p11 }
  0x8f   : > { %3017 = shalt.err (!%p3014_p12)
}
  0x90   : > { %s3018_s27 = scalar_lea.vmem %s527_s1, 16  ;;  %s3396_s29 = smov [#allocation14]  }
  0x91   : > { %p3019_p2 = scmp.ne.s32.totalorder %s527_s1, %s3018_s27  ;;  %s3023_s18 = sshll.u32 %s3396_s29, 4  ;;  %s3024_s18 = int_to_ptr.vmem [resolvable:$false] %s3023_s18 }
  0x92   : > { %s3025_s10 = scalar_lea.vmem %s3024_s18, 32  ;;  %p3026_p0 = scmp.lt.s32.totalorder %s527_s1, %s3024_s18 }
  0x93   : > { %p3021_p4 = pnand %p3019_p2, %p3612_p9  ;;  %p3027_p7 = scmp.lt.s32.totalorder %s3025_s10, %s3018_s27 }
  0x95   : > { %p3022_p6 = pneg %p3021_p4  ;;  %p3028_p8 = por %p3027_p7, %p3026_p0 }
  0x97   : > { %p3029_p5 = pnand %p3028_p8, %p3022_p6 }
  0x99   : > { %3032 = shalt.err (!%p3029_p5)
}
  0x9a   : > { %p4364_p13 = scmp.ne.s32.totalorder %s4356_s25, 0  ;;  %s4365_s9 = sld [smem:[#allocation43_spill]] }
  0x9b   : > { %s554_s18 = scalar_lea.vmem [#allocation17], %s3638_s12  ;;  %s2446_s26 = sshll.u32 %s3560_s24, 6 }
  0x9c   : > { %2757 = dma.hbm_to_vmem [thread:$0]  (!%p4364_p13), %s3683_s19, 16, %s527_s1, %s4331_s3  }
  0x9d   : > { %s561_s14 = sshll.u32 %s554_s18, 4  ;;  %s4332_s15 = scalar_lea.sflag [#allocation18], %s3557_s23  ;;  %s3713_s14 = int_to_ptr.vmem [resolvable:$true] %s561_s14 }
  0xa0   : > { %s3710_s16 = scalar_lea.hbm %s4365_s9, %s3641_s17  ;;  %s3038_s10 = scalar_lea.hbm %s4365_s9, 512 }
  0xa1   : > { %s3033_s27 = scalar_lea.hbm %s3710_s16, 256  ;;  %p3039_p1 = scmp.lt.u32.totalorder %s3710_s16, %s4365_s9 }
  0xa2   : > { %p3034_p8 = scmp.ne.s32.totalorder %s3710_s16, %s3033_s27  ;;  %p3040_p3 = scmp.lt.u32.totalorder %s3038_s10, %s3033_s27 }
  0xa3   : > { %p3042_p2 = scmp.lt.u32.totalorder %s3033_s27, %s3710_s16 }
  0xa4   : > { %p3036_p11 = pnand %p3034_p8, %p3612_p9  ;;  %p3041_p12 = por %p3040_p3, %p3039_p1 }
  0xa6   : > { %p3037_p10 = pneg %p3036_p11  ;;  %p3043_p4 = por %p3042_p2, %p3041_p12 }
  0xa8   : > { %p3044_p6 = pnand %p3043_p4, %p3037_p10 }
  0xaa   : > { %3047 = shalt.err (!%p3044_p6)
}
  0xab   : > { %s3048_s18 = scalar_lea.vmem %s3713_s14, 256  ;;  %s3397_s19 = smov [#allocation17]  }
  0xac   : > { %p3049_p0 = scmp.ne.s32.totalorder %s3713_s14, %s3048_s18  ;;  %s3053_s1 = sshll.u32 %s3397_s19, 4  ;;  %s3054_s1 = int_to_ptr.vmem [resolvable:$false] %s3053_s1 }
  0xad   : > { %s3055_s5 = scalar_lea.vmem %s3054_s1, 512  ;;  %p3056_p8 = scmp.lt.s32.totalorder %s3713_s14, %s3054_s1 }
  0xae   : > { %p3051_p7 = pnand %p3049_p0, %p3612_p9  ;;  %p3057_p11 = scmp.lt.s32.totalorder %s3055_s5, %s3048_s18 }
  0xb0   : > { %p3052_p5 = pneg %p3051_p7  ;;  %p3058_p1 = por %p3057_p11, %p3056_p8 }
  0xb2   : > { %p3059_p3 = pnand %p3058_p1, %p3052_p5 }
  0xb4   : > { %3062 = shalt.err (!%p3059_p3)
}
  0xb5   : > { %s4366_s27 = smov 64   ;;  %s2505_s10 = sshll.u32 %s3387_s28, 10 }
  0xb6   : > { %2763 = dma.hbm_to_vmem [thread:$0]  (!%p4364_p13), %s3710_s16, 256, %s3713_s14, %s4332_s15, %s4366_s27, %s4366_s27, %s3395_s30  }
  0xb7   : > { %s3747_s19 = scalar_lea.hbm %s4300_s11, %s2505_s10  ;;  %s592_s1 = scalar_lea.vmem [#allocation20], %s2446_s26 }
  0xb8   : > { %s599_s5 = sshll.u32 %s592_s1, 4  ;;  %s589_s3 = scalar_lea.sflag [#allocation21], %s3557_s23  ;;  %s3751_s5 = int_to_ptr.vmem [resolvable:$true] %s599_s5 }
  0xb9   : > { %s3063_s7 = scalar_lea.hbm %s3747_s19, 1024  ;;  %s3068_s14 = scalar_lea.hbm %s4300_s11, 2048 }
  0xba   : > { %p3064_p10 = scmp.ne.s32.totalorder %s3747_s19, %s3063_s7  ;;  %p3069_p4 = scmp.lt.u32.totalorder %s3747_s19, %s4300_s11 }
  0xbb   : > { %p3070_p6 = scmp.lt.u32.totalorder %s3068_s14, %s3063_s7  ;;  %p3072_p7 = scmp.lt.u32.totalorder %s3063_s7, %s3747_s19 }
  0xbc   : > { %p3066_p12 = pnand %p3064_p10, %p3612_p9 }
  0xbd   : > { %p3071_p0 = por %p3070_p6, %p3069_p4 }
  0xbe   : > { %p3067_p2 = pneg %p3066_p12 }
  0xbf   : > { %p3073_p5 = por %p3072_p7, %p3071_p0 }
  0xc1   : > { %p3074_p8 = pnand %p3073_p5, %p3067_p2 }
  0xc3   : > { %3077 = shalt.err (!%p3074_p8)
}
  0xc4   : > { %s3078_s26 = scalar_lea.vmem %s3751_s5, 1024  ;;  %s3398_s18 = smov [#allocation20]  }
  0xc5   : > { %p3079_p11 = scmp.ne.s32.totalorder %s3751_s5, %s3078_s26  ;;  %s3083_s1 = sshll.u32 %s3398_s18, 4  ;;  %s3084_s1 = int_to_ptr.vmem [resolvable:$false] %s3083_s1 }
  0xc6   : > { %s3085_s28 = scalar_lea.vmem %s3084_s1, 2048  ;;  %p3086_p10 = scmp.lt.s32.totalorder %s3751_s5, %s3084_s1 }
  0xc7   : > { %p3081_p1 = pnand %p3079_p11, %p3612_p9  ;;  %p3087_p12 = scmp.lt.s32.totalorder %s3085_s28, %s3078_s26 }
  0xc9   : > { %p3082_p3 = pneg %p3081_p1  ;;  %p3088_p4 = por %p3087_p12, %p3086_p10 }
  0xcb   : > { %p3089_p6 = pnand %p3088_p4, %p3082_p3 }
  0xcd   : > { %3092 = shalt.err (!%p3089_p6)
}
  0xce   : > { %2769 = dma.hbm_to_vmem [thread:$0]  (!%p4364_p13), %s3747_s19, 1024, %s3751_s5, %s589_s3, %s4366_s27, %s4366_s27, %s3395_s30  }
  0xcf   : > { %s3399_s7 = smov [#allocation2]   ;;  %s3400_s14 = smov [#allocation7]  }
  0xd0   : > { %s402_s16 = sshll.u32 %s3399_s7, 4  ;;  %s429_s10 = sshll.u32 %s3400_s14, 4  ;;  %s403_s16 = int_to_ptr.vmem [resolvable:$true] %s402_s16  ;;  %s430_s10 = int_to_ptr.vmem [resolvable:$true] %s429_s10 }
  0xd1   : > { %s3093_s18 = scalar_lea.hbm %s4289_s0, 256  ;;  %p4367_p0 = scmp.ne.s32.totalorder %s4358_s13, 0 }
  0xd2   : > { %p3094_p2 = scmp.ne.s32.totalorder %s4289_s0, %s3093_s18  ;;  %p3100_p8 = scmp.lt.u32.totalorder %s3093_s18, %s4289_s0 }
  0xd4   : > { %p3096_p7 = pnand %p3094_p2, %p4367_p0 }
  0xd6   : > { %p3097_p5 = pneg %p3096_p7 }
  0xd8   : > { %p3102_p11 = pnand %p3100_p8, %p3097_p5 }
  0xda   : > { %3105 = shalt.err (!%p3102_p11)
}
  0xdb   : > { %s3106_s19 = scalar_lea.vmem %s403_s16, 256  ;;  %p3114_p12 = scmp.lt.s32.totalorder %s403_s16, %s403_s16 }
  0xdc   : > { %p3107_p1 = scmp.ne.s32.totalorder %s403_s16, %s3106_s19  ;;  %p3115_p4 = scmp.lt.s32.totalorder %s3106_s19, %s3106_s19 }
  0xde   : > { %p3109_p3 = pnand %p3107_p1, %p4367_p0  ;;  %p3116_p6 = por %p3115_p4, %p3114_p12 }
  0xe0   : > { %p3110_p10 = pneg %p3109_p3 }
  0xe2   : > { %p3117_p13 = pnand %p3116_p6, %p3110_p10 }
  0xe4   : > { %3120 = shalt.err (!%p3117_p13)
}
  0xe5   : > { %p4368_p2 = scmp.ne.s32.totalorder %s4355_s22, 0  ;;  %s4369_s5 = smov 8  }
  0xe6   : > { %s4370_s7 = smov 128   ;;  %s3121_s26 = scalar_lea.hbm %s4291_s2, 128 }
  0xe7   : > { %2735 = dma.hbm_to_vmem [thread:$0]  (!%p4368_p2), %s4289_s0, 256, %s403_s16, [#allocation3], %s4370_s7, %s4370_s7, %s4369_s5  }
  0xe8   : > { %p3122_p7 = scmp.ne.s32.totalorder %s4291_s2, %s3121_s26  ;;  %p3128_p8 = scmp.lt.u32.totalorder %s3121_s26, %s4291_s2 }
  0xea   : > { %p3124_p13 = pnand %p3122_p7, %p4367_p0 }
  0xec   : > { %p3125_p5 = pneg %p3124_p13 }
  0xee   : > { %p3130_p11 = pnand %p3128_p8, %p3125_p5 }
  0xf0   : > { %3133 = shalt.err (!%p3130_p11)
}
  0xf1   : > { %s3134_s9 = scalar_lea.vmem %s430_s10, 128  ;;  %p3142_p12 = scmp.lt.s32.totalorder %s430_s10, %s430_s10 }
  0xf2   : > { %p3135_p1 = scmp.ne.s32.totalorder %s430_s10, %s3134_s9  ;;  %p3143_p4 = scmp.lt.s32.totalorder %s3134_s9, %s3134_s9 }
  0xf4   : > { %p3137_p3 = pnand %p3135_p1, %p4367_p0  ;;  %p3144_p6 = por %p3143_p4, %p3142_p12 }
  0xf6   : > { %p3138_p10 = pneg %p3137_p3 }
  0xf8   : > { %p3145_p9 = pnand %p3144_p6, %p3138_p10 }
  0xfa   : > { %3148 = shalt.err (!%p3145_p9)
}
  0xfb   : > { %2741 = dma.hbm_to_vmem [thread:$0]  (!%p4368_p2), %s4291_s2, 128, %s430_s10, [#allocation6]  }
  0xfc   : > { %s3823_s13 = scalar_lea.hbm %s4293_s4, %s3596_s20  ;;  %s460_s14 = scalar_lea.vmem [#allocation10], %s3560_s24 }
  0xfd   : > { %s467_s29 = sshll.u32 %s460_s14, 4  ;;  %s3149_s22 = scalar_lea.hbm %s3823_s13, 16  ;;  %s468_s29 = int_to_ptr.vmem [resolvable:$true] %s467_s29 }
  0xfe   : > { %p3150_p9 = scmp.ne.s32.totalorder %s3823_s13, %s3149_s22  ;;  %p4371_p0 = scmp.ne.s32.totalorder %s4361_s21, 0 }
  0xff   : > { %s3154_s10 = scalar_lea.hbm %s4293_s4, 32  ;;  %p3155_p2 = scmp.lt.u32.totalorder %s3823_s13, %s4293_s4 }
 0x100   : > { %p3152_p7 = pnand %p3150_p9, %p4371_p0  ;;  %p3156_p5 = scmp.lt.u32.totalorder %s3154_s10, %s3149_s22 }
 0x101   : > { %p3158_p11 = scmp.lt.u32.totalorder %s3149_s22, %s3823_s13 }
 0x102   : > { %p3153_p13 = pneg %p3152_p7  ;;  %p3157_p8 = por %p3156_p5, %p3155_p2 }
 0x104   : > { %p3159_p1 = por %p3158_p11, %p3157_p8 }
 0x106   : > { %p3160_p3 = pnand %p3159_p1, %p3153_p13 }
 0x108   : > { %3163 = shalt.err (!%p3160_p3)
}
 0x109   : > { %s3164_s19 = scalar_lea.vmem %s468_s29, 16  ;;  %s3401_s9 = smov [#allocation10]  }
 0x10a   : > { %p3165_p10 = scmp.ne.s32.totalorder %s468_s29, %s3164_s19  ;;  %s3169_s16 = sshll.u32 %s3401_s9, 4  ;;  %s3170_s16 = int_to_ptr.vmem [resolvable:$false] %s3169_s16 }
 0x10b   : > { %s3171_s5 = scalar_lea.vmem %s3170_s16, 32  ;;  %p3172_p6 = scmp.lt.s32.totalorder %s468_s29, %s3170_s16 }
 0x10c   : > { %p3167_p12 = pnand %p3165_p10, %p4371_p0  ;;  %p3173_p9 = scmp.lt.s32.totalorder %s3171_s5, %s3164_s19 }
 0x10e   : > { %p3168_p4 = pneg %p3167_p12  ;;  %p3174_p7 = por %p3173_p9, %p3172_p6 }
 0x110   : > { %p3175_p2 = pnand %p3174_p7, %p3168_p4 }
 0x112   : > { %3178 = shalt.err (!%p3175_p2)
}
 0x113   : > { %p4372_p5 = scmp.ne.s32.totalorder %s4356_s25, 0  ;;  %s4373_s7 = scalar_lea.sflag [#allocation9], %s3557_s23 }
 0x114   : > { %s3849_s22 = scalar_lea.hbm %s4295_s6, %s3641_s17  ;;  %s499_s26 = scalar_lea.vmem [#allocation13], %s3638_s12 }
 0x115   : > { %2748 = dma.hbm_to_vmem [thread:$0]  (!%p4372_p5), %s3823_s13, 16, %s468_s29, %s4373_s7  }
 0x116   : > { %s506_s18 = sshll.u32 %s499_s26, 4  ;;  %s3179_s10 = scalar_lea.hbm %s3849_s22, 256  ;;  %s3852_s18 = int_to_ptr.vmem [resolvable:$true] %s506_s18 }
 0x117   : > { %p3180_p13 = scmp.ne.s32.totalorder %s3849_s22, %s3179_s10  ;;  %s3184_s29 = scalar_lea.hbm %s4295_s6, 512 }
 0x118   : > { %p3185_p1 = scmp.lt.u32.totalorder %s3849_s22, %s4295_s6  ;;  %p3186_p3 = scmp.lt.u32.totalorder %s3184_s29, %s3179_s10 }
 0x119   : > { %p3182_p8 = pnand %p3180_p13, %p4371_p0  ;;  %p3188_p12 = scmp.lt.u32.totalorder %s3179_s10, %s3849_s22 }
 0x11a   : > { %p3187_p10 = por %p3186_p3, %p3185_p1 }
 0x11b   : > { %p3183_p11 = pneg %p3182_p8 }
 0x11c   : > { %p3189_p4 = por %p3188_p12, %p3187_p10 }
 0x11e   : > { %p3190_p6 = pnand %p3189_p4, %p3183_p11 }
 0x120   : > { %3193 = shalt.err (!%p3190_p6)
}
 0x121   : > { %s3194_s12 = scalar_lea.vmem %s3852_s18, 256  ;;  %s3402_s19 = smov [#allocation13]  }
 0x122   : > { %p3195_p9 = scmp.ne.s32.totalorder %s3852_s18, %s3194_s12  ;;  %s3199_s9 = sshll.u32 %s3402_s19, 4  ;;  %s3200_s9 = int_to_ptr.vmem [resolvable:$false] %s3199_s9 }
 0x123   : > { %s3201_s16 = scalar_lea.vmem %s3200_s9, 512  ;;  %p3202_p13 = scmp.lt.s32.totalorder %s3852_s18, %s3200_s9 }
 0x124   : > { %p3197_p7 = pnand %p3195_p9, %p4371_p0  ;;  %p3203_p8 = scmp.lt.s32.totalorder %s3201_s16, %s3194_s12 }
 0x126   : > { %p3198_p2 = pneg %p3197_p7  ;;  %p3204_p1 = por %p3203_p8, %p3202_p13 }
 0x128   : > { %p3205_p3 = pnand %p3204_p1, %p3198_p2 }
 0x12a   : > { %3208 = shalt.err (!%p3205_p3)
}
 0x12b   : > { %s4374_s5 = scalar_lea.sflag [#allocation12], %s3557_s23  ;;  %s3884_s14 = scalar_lea.hbm %s4297_s8, %s3596_s20 }
 0x12c   : > { %2754 = dma.hbm_to_vmem [thread:$0]  (!%p4372_p5), %s3849_s22, 256, %s3852_s18, %s4374_s5, %s4366_s27, %s4366_s27, %s3395_s30  }
 0x12d   : > { %s536_s26 = scalar_lea.vmem [#allocation16], %s3560_s24  ;;  %s3209_s1 = scalar_lea.hbm %s3884_s14, 16 }
 0x12e   : > { %s543_s10 = sshll.u32 %s536_s26, 4  ;;  %p3210_p11 = scmp.ne.s32.totalorder %s3884_s14, %s3209_s1  ;;  %s544_s10 = int_to_ptr.vmem [resolvable:$true] %s543_s10 }
 0x12f   : > { %s3214_s30 = scalar_lea.hbm %s4297_s8, 32  ;;  %p3215_p4 = scmp.lt.u32.totalorder %s3884_s14, %s4297_s8 }
 0x130   : > { %p3212_p10 = pnand %p3210_p11, %p4371_p0  ;;  %p3216_p6 = scmp.lt.u32.totalorder %s3214_s30, %s3209_s1 }
 0x131   : > { %p3218_p7 = scmp.lt.u32.totalorder %s3209_s1, %s3884_s14 }
 0x132   : > { %p3213_p12 = pneg %p3212_p10  ;;  %p3217_p9 = por %p3216_p6, %p3215_p4 }
 0x134   : > { %p3219_p2 = por %p3218_p7, %p3217_p9 }
 0x136   : > { %p3220_p13 = pnand %p3219_p2, %p3213_p12 }
 0x138   : > { %3223 = shalt.err (!%p3220_p13)
}
 0x139   : > { %s3224_s18 = scalar_lea.vmem %s544_s10, 16  ;;  %s3403_s28 = smov [#allocation16]  }
 0x13a   : > { %p3225_p8 = scmp.ne.s32.totalorder %s544_s10, %s3224_s18  ;;  %s3229_s17 = sshll.u32 %s3403_s28, 4  ;;  %s3230_s17 = int_to_ptr.vmem [resolvable:$false] %s3229_s17 }
 0x13b   : > { %s3231_s12 = scalar_lea.vmem %s3230_s17, 32  ;;  %p3232_p11 = scmp.lt.s32.totalorder %s544_s10, %s3230_s17 }
 0x13c   : > { %p3227_p1 = pnand %p3225_p8, %p4371_p0  ;;  %p3233_p10 = scmp.lt.s32.totalorder %s3231_s12, %s3224_s18 }
 0x13e   : > { %p3228_p3 = pneg %p3227_p1  ;;  %p3234_p5 = por %p3233_p10, %p3232_p11 }
 0x140   : > { %p3235_p4 = pnand %p3234_p5, %p3228_p3 }
 0x142   : > { %3238 = shalt.err (!%p3235_p4)
}
 0x143   : > { %p4375_p6 = scmp.ne.s32.totalorder %s4356_s25, 0  ;;  %s4376_s19 = scalar_lea.sflag [#allocation15], %s3557_s23 }
 0x144   : > { %s4377_s5 = sld [smem:[#allocation44_spill]]  ;;  %s574_s15 = scalar_lea.vmem [#allocation19], %s3560_s24 }
 0x145   : > { %2760 = dma.hbm_to_vmem [thread:$0]  (!%p4375_p6), %s3884_s14, 16, %s544_s10, %s4376_s19  }
 0x146   : > { %s581_s26 = sshll.u32 %s574_s15, 4  ;;  %s582_s26 = int_to_ptr.vmem [resolvable:$true] %s581_s26 }
 0x14a   : > { %s3910_s7 = scalar_lea.hbm %s4377_s5, %s3596_s20  ;;  %s3244_s14 = scalar_lea.hbm %s4377_s5, 32 }
 0x14b   : > { %s3239_s1 = scalar_lea.hbm %s3910_s7, 16  ;;  %p3245_p7 = scmp.lt.u32.totalorder %s3910_s7, %s4377_s5 }
 0x14c   : > { %p3240_p5 = scmp.ne.s32.totalorder %s3910_s7, %s3239_s1  ;;  %p3246_p2 = scmp.lt.u32.totalorder %s3244_s14, %s3239_s1 }
 0x14d   : > { %p3248_p8 = scmp.lt.u32.totalorder %s3239_s1, %s3910_s7 }
 0x14e   : > { %p3242_p12 = pnand %p3240_p5, %p4371_p0  ;;  %p3247_p13 = por %p3246_p2, %p3245_p7 }
 0x150   : > { %p3243_p9 = pneg %p3242_p12  ;;  %p3249_p1 = por %p3248_p8, %p3247_p13 }
 0x152   : > { %p3250_p3 = pnand %p3249_p1, %p3243_p9 }
 0x154   : > { %3253 = shalt.err (!%p3250_p3)
}
 0x155   : > { %s3254_s27 = scalar_lea.vmem %s582_s26, 16  ;;  %s3404_s22 = smov [#allocation19]  }
 0x156   : > { %p3255_p11 = scmp.ne.s32.totalorder %s582_s26, %s3254_s27  ;;  %s3259_s18 = sshll.u32 %s3404_s22, 4  ;;  %s3260_s18 = int_to_ptr.vmem [resolvable:$false] %s3259_s18 }
 0x157   : > { %s3261_s28 = scalar_lea.vmem %s3260_s18, 32  ;;  %p3262_p5 = scmp.lt.s32.totalorder %s582_s26, %s3260_s18 }
 0x158   : > { %p3257_p10 = pnand %p3255_p11, %p4371_p0  ;;  %p3263_p12 = scmp.lt.s32.totalorder %s3261_s28, %s3254_s27 }
 0x15a   : > { %p3258_p4 = pneg %p3257_p10  ;;  %p3264_p6 = por %p3263_p12, %p3262_p5 }
 0x15c   : > { %p3265_p2 = pnand %p3264_p6, %p3258_p4 }
 0x15e   : > { %3268 = shalt.err (!%p3265_p2)
}
 0x15f   : > { %p4378_p7 = scmp.ne.s32.totalorder %s4356_s25, 0  ;;  %s4379_s17 = scalar_lea.sflag [#allocation18], %s3557_s23 }
 0x160   : > { %s4380_s9 = sld [smem:[#allocation45_spill]]  ;;  %s612_s15 = scalar_lea.vmem [#allocation22], %s3560_s24 }
 0x161   : > { %2766 = dma.hbm_to_vmem [thread:$0]  (!%p4378_p7), %s3910_s7, 16, %s582_s26, %s4379_s17  }
 0x162   : > { %s619_s1 = sshll.u32 %s612_s15, 4  ;;  %s620_s1 = int_to_ptr.vmem [resolvable:$true] %s619_s1 }
 0x166   : > { %s3936_s16 = scalar_lea.hbm %s4380_s9, %s3596_s20  ;;  %s3274_s7 = scalar_lea.hbm %s4380_s9, 32 }
 0x167   : > { %s3269_s13 = scalar_lea.hbm %s3936_s16, 16  ;;  %p3275_p8 = scmp.lt.u32.totalorder %s3936_s16, %s4380_s9 }
 0x168   : > { %p3270_p6 = scmp.ne.s32.totalorder %s3936_s16, %s3269_s13  ;;  %p3276_p1 = scmp.lt.u32.totalorder %s3274_s7, %s3269_s13 }
 0x169   : > { %p3278_p11 = scmp.lt.u32.totalorder %s3269_s13, %s3936_s16 }
 0x16a   : > { %p3272_p9 = pnand %p3270_p6, %p4371_p0  ;;  %p3277_p3 = por %p3276_p1, %p3275_p8 }
 0x16c   : > { %p3273_p13 = pneg %p3272_p9  ;;  %p3279_p10 = por %p3278_p11, %p3277_p3 }
 0x16e   : > { %p3280_p4 = pnand %p3279_p10, %p3273_p13 }
 0x170   : > { %3283 = shalt.err (!%p3280_p4)
}
 0x171   : > { %s3284_s24 = scalar_lea.vmem %s620_s1, 16  ;;  %s3405_s20 = smov [#allocation22]  }
 0x172   : > { %p3285_p5 = scmp.ne.s32.totalorder %s620_s1, %s3284_s24  ;;  %s3289_s30 = sshll.u32 %s3405_s20, 4  ;;  %s3290_s30 = int_to_ptr.vmem [resolvable:$false] %s3289_s30 }
 0x173   : > { %s3291_s27 = scalar_lea.vmem %s3290_s30, 32  ;;  %p3292_p6 = scmp.lt.s32.totalorder %s620_s1, %s3290_s30 }
 0x174   : > { %p3287_p12 = pnand %p3285_p5, %p4371_p0  ;;  %p3293_p9 = scmp.lt.s32.totalorder %s3291_s27, %s3284_s24 }
 0x176   : > { %p3288_p2 = pneg %p3287_p12  ;;  %p3294_p7 = por %p3293_p9, %p3292_p6 }
 0x178   : > { %p3295_p1 = pnand %p3294_p7, %p3288_p2 }
 0x17a   : > { %3298 = shalt.err (!%p3295_p1)
}
 0x17b   : > { %p4381_p8 = scmp.ne.s32.totalorder %s4356_s25, 0  ;;  %s4382_s22 = sld [smem:[#allocation38_spill]] }
 0x17d   : > { %2772 = dma.hbm_to_vmem [thread:$0]  (!%p4381_p8), %s3936_s16, 16, %s620_s1, %s589_s3  }
 0x181   : > { %p4383_p13 = scmp.ne.s32.totalorder %s4382_s22, 0 }
 0x182   : > { %s4384_s21 = sld [smem:[#allocation34_spill]] (!%p4383_p13) }
 0x183   : > { %628 = sbr.rel (%p4383_p13) target bundleno = 4591 (0x11ef), region = 72 }
 0x188   : > { %p4385_p0 = scmp.eq.s32.totalorder (!%p4383_p13), %s4384_s21, 0 }
 0x18a   : > { %3342 = dma.done.wait (%p4385_p0), [#allocation3], 256   ;;  %p4386_p3 = pmov %p4385_p0 }
 0x18b   : > { %p4387_p11 = pmov %p4385_p0 }
 0x18c   : > { %3344 = vsyncadd (%p4386_p3), [#allocation3], 4294967040 }
 0x18d   : > { %3346 = dma.done.wait (%p4387_p11), [#allocation6], 384   ;;  %p4388_p7 = pmov %p4385_p0 }
 0x18e   : > { %s4389_s25 = sld [smem:[#allocation32_spill]]  ;;  %s4390_s23 = sld [smem:[#allocation37_spill]] }
 0x18f   : > { %3348 = vsyncadd (%p4388_p7), [#allocation6], 4294966912  ;;  %s642_s18 = sand.u32 1, %s4384_s21  }
 0x190   : > { %s643_s28 = scalar_lea.sflag [#allocation9], %s642_s18 }
 0x194   : > { %s3970_s3 = sand.u32 1, %s4389_s25   ;;  %p4391_p10 = scmp.ne.s32.totalorder %s4390_s23, 0 }
 0x195   : > { %s645_s17 = scalar_lea.vmem [#allocation8], %s3970_s3 }
 0x196   : > { %3350 = dma.done.wait (%p4391_p10), %s643_s28, 32  }
 0x197   : > { %3352 = vsyncadd (%p4391_p10), %s643_s28, 4294967264  ;;  %s3978_s12 = sshll.u32 %s3970_s3, 4  ;;  %s653_s19 = scalar_lea.vmem [#allocation10], %s3970_s3 }
 0x198   : > { %s659_s16 = scalar_lea.sflag [#allocation12], %s642_s18  ;;  %s662_s15 = scalar_lea.vmem [#allocation11], %s3978_s12 }
 0x199   : > { %3354 = dma.done.wait (%p4391_p10), %s659_s16, 512  }
 0x19a   : > { %3356 = vsyncadd (%p4391_p10), %s659_s16, 4294966784  ;;  %s671_s1 = scalar_lea.vmem [#allocation13], %s3978_s12  ;;  %s677_s13 = scalar_lea.sflag [#allocation15], %s642_s18 }
 0x19b   : > { %s679_s29 = scalar_lea.vmem [#allocation14], %s3970_s3 }
 0x19c   : > { %3358 = dma.done.wait (%p4391_p10), %s677_s13, 32  }
 0x19d   : > { %3360 = vsyncadd (%p4391_p10), %s677_s13, 4294967264  ;;  %s687_s14 = scalar_lea.vmem [#allocation16], %s3970_s3  ;;  %s693_s7 = scalar_lea.sflag [#allocation18], %s642_s18 }
 0x19e   : > { %s696_s26 = scalar_lea.vmem [#allocation17], %s3978_s12 }
 0x19f   : > { %3362 = dma.done.wait (%p4391_p10), %s693_s7, 272  }
 0x1a0   : > { %3364 = vsyncadd (%p4391_p10), %s693_s7, 4294967024  ;;  %s2457_s10 = sshll.u32 %s3970_s3, 6  ;;  %s704_s24 = scalar_lea.vmem [#allocation19], %s3970_s3 }
 0x1a1   : > { %s710_s20 = scalar_lea.sflag [#allocation21], %s642_s18  ;;  %s4000_s30 = scalar_lea.vmem [#allocation20], %s2457_s10 }
 0x1a2   : > { %3366 = dma.done.wait (%p4391_p10), %s710_s20, 1040  }
 0x1a3   : > { %3368 = vsyncadd (%p4391_p10), %s710_s20, 4294966256  ;;  %s721_s27 = scalar_lea.vmem [#allocation22], %s3970_s3  ;;  %p4392_p4 = scmp.ne.s32.totalorder %s4384_s21, 0 }
 0x1a4   : > { %v803_v0 = vld [vmem:[#allocation2] sm:$0xff] (!%p4392_p4)  ;;  %vm805_vm0 = vcmask (!%p4392_p4), 261120   ;;  %v804_v1 = vld [vmem:[#allocation2 + $0x8] sm:$0xff] (!%p4392_p4) }
 0x1a5   : > { %802 = sbr.rel (%p4392_p4) target bundleno = 428 (0x1ac), region = 128  ;;  %806 = vst.msk [vmem:[#allocation23] sm:$0xff] (!%p4392_p4), %vm805_vm0, %v803_v0  ;;  %807 = vst.msk [vmem:[#allocation23 + $0x8] sm:$0xff] (!%p4392_p4), %vm805_vm0, %v804_v1 }
 0x1ac PF: > { %v4009_v2 = vld [vmem:[#allocation23] sm:$0xff]  ;;  %vm815_vm1 = vcmask 261120   ;;  %v4011_v3 = vld [vmem:[#allocation23 + $0x8] sm:$0xff]  ;;  %v3406_v17 = vmov 0.0   ;;  %vm3407_vm2 = vmmov 0   ;;  %s3408_s22 = smov 96  }
 0x1ad   : > { %v816_v4 = vsel %vm815_vm1, %v4009_v2, 0.0  ;;  %v819_v5 = vsel %vm815_vm1, %v4011_v3, 0.0  ;;  %v2857_v16 = vld [vmem:[%s662_s15] sm:$0xff]   ;;  %2556 = vmatprep.subr.bf16.mxu0 %v3406_v17  ;;  %2576 = vmatprep.subr.bf16.mxu1 %v3406_v17  ;;  %v2858_v18 = vld [vmem:[%s662_s15 + $0x8] sm:$0xff]   ;;  %vm929_vm3 = vcmask 64512   ;;  %s3409_s21 = smov 64  }
 0x1ae   : > { %817 = vadd.xlane.f32.xlu0 %v816_v4  ;;  %2557 = vmatpush3.bf16.msra.mxu0 %v2857_v16  ;;  %v2459_v27 = vld [vmem:[%s645_s17] ss:$0 sm:$0xff]  ;;  %s3410_s25 = smov 88   ;;  %vm1054_vm4 = vcmask 1043456   ;;  %s3411_s23 = smov 120   ;;  %vm1834_vm5 = vcmask 130048  }
 0x1af   : > { %2560 = vmatprep.mubr.msk.bf16.mxu0 %vm3407_vm2, %v3406_v17  ;;  %2558 = vmatprep.subr.bf16.mxu0 %v3406_v17  ;;  %v2460_v31 = vld [vmem:[%s653_s19] ss:$0 sm:$0xff]  ;;  %s3412_s18 = smov 56   ;;  %s3413_s28 = smov 80   ;;  %vm1837_vm6 = vcmask 195584  }
 0x1b0   : > { %2578 = vmatprep.mubr.msk.bf16.mxu1 %vm3407_vm2, %v3406_v17  ;;  %v4062_v50 = vld [vmem:[#allocation7] sm:$0xff]  ;;  %s3414_s17 = smov 112   ;;  %s3415_s19 = smov 48  }
 0x1b1   : > { %s3416_s16 = smov 72   ;;  %s3417_s15 = smov 104  }
 0x1b2   : > { %820 = vadd.xlane.f32.xlu0 %v819_v5  ;;  %2559 = vmatpush3.bf16.msra.mxu0 %v2858_v18  ;;  %s3418_s13 = smov 40   ;;  %s3419_s7 = smov 8  }
 0x1b3   : > { %2564 = vmatprep.subr.bf16.mxu0 %v3406_v17  ;;  %s3420_s10 = smov 16   ;;  %s3422_s20 = smov 24  }
 0x1b4   : > { %s4393_s12 = sld [smem:[#allocation34_spill]] }
 0x1ba   : > { %p2780_p5 = scmp.eq.s32.totalorder %s4393_s12, 1 }
 0x23b   : > { %v818_v6 = vpop.xlane.xlu0 %817 }
 0x23c   : > { %v823_v7 = vmul.f32 0.03125, %v818_v6 }
 0x23e   : > { %v825_v8 = vsub.f32 %v4009_v2, %v823_v7 }
 0x23f   : > { %v821_v9 = vpop.xlane.xlu0 %820 }
 0x240   : > { %v824_v10 = vmul.f32 0.03125, %v821_v9  ;;  %v827_v11 = vmul.f32 %v825_v8, %v825_v8 }
 0x242   : > { %v826_v12 = vsub.f32 %v4011_v3, %v824_v10  ;;  %v829_v13 = vsel %vm815_vm1, %v827_v11, 0.0 }
 0x243   : > { %830 = vadd.xlane.f32.xlu1 %v829_v13 }
 0x244   : > { %v828_v14 = vmul.f32 %v826_v12, %v826_v12 }
 0x246   : > { %v832_v15 = vsel %vm815_vm1, %v828_v14, 0.0 }
 0x247   : > { %833 = vadd.xlane.f32.xlu1 %v832_v15 }
 0x2d0   : > { %v831_v19 = vpop.xlane.xlu1 %830 }
 0x2d1   : > { %v835_v20 = vmul.f32 0.03125, %v831_v19 }
 0x2d3   : > { %v837_v21 = vadd.f32 1e-05, %v835_v20 }
 0x2d4   : > { %v834_v22 = vpop.xlane.xlu1 %833 }
 0x2d5   : > { %2871 = vrsqrt.f32 %v837_v21  ;;  %v836_v23 = vmul.f32 0.03125, %v834_v22 }
 0x2d7   : > { %v838_v24 = vadd.f32 1e-05, %v836_v23 }
 0x2d9   : > { %2873 = vrsqrt.f32 %v838_v24 }
 0x2df   : > { %v2872_v25 = vpop.eup %2871 }
 0x2e0   : > { %v841_v26 = vmul.f32 %v2872_v25, %v825_v8 }
 0x2e2   : > { %v849_v30 = vmul.f32 %v2459_v27, %v841_v26 }
 0x2e3   : > { %v2874_v28 = vpop.eup %2873 }
 0x2e4   : > { %v842_v29 = vmul.f32 %v2874_v28, %v826_v12  ;;  %v857_v33 = vadd.f32 %v2460_v31, %v849_v30 }
 0x2e6   : > { %v850_v32 = vmul.f32 %v2459_v27, %v842_v29 }
 0x2e8   : > { %v858_v34 = vadd.f32 %v2460_v31, %v850_v32 }
 0x2ea   : > { %v859_v35 = vpack.c.bf16 %v858_v34, %v857_v33 }
 0x2ec   : > { %2561 = vmatmul.mubr.msk.bf16.vlgmr.msra.gmra.mrb[0].mxu0 %vm815_vm1, %v859_v35 }
 0x2ed   : > { %2566 = vmatprep.mubr.msk.bf16.mxu0 %vm3407_vm2, %v3406_v17 }
 0x3bf   : > { %v913_v36 = vpop.f32.mrb[0].mxu0 }
 0x3c0   : > { %v4040_v37 = vpack.c.bf16 %v913_v36, %v913_v36  ;;  %v2562_v38 = vpop.f32.mrb[1].mxu0  ;;  %v920_v44 = vmul.f32 0.35355338, %v913_v36 }
 0x3c1   : > { %v916_v39 = vpop.f32.mrb[2].mxu0 }
 0x3c2   : > { %v4042_v40 = vpack.c.bf16 %v916_v39, %v916_v39  ;;  %927 = vrot.lane.b32.xlu0 %v4040_v37, %s3408_s22  ;;  %v2563_v41 = vpop.f32.mrb[3].mxu0  ;;  %v4048_v46 = vpack.c.bf16 %v920_v44, %v920_v44  ;;  %v921_v48 = vmul.f32 0.35355338, %v916_v39 }
 0x3c4   : > { %977 = vrot.lane.b32.xlu1 %v4042_v40, %s3408_s22  ;;  %v4056_v49 = vpack.c.bf16 %v921_v48, %v921_v48 }
 0x434   : > { %v928_v42 = vpop.permute.xlu0 %927 }
 0x435   : > { %v934_v43 = vsel %vm929_vm3, %v928_v42, 0 }
 0x436   : > { %2565 = vmatpush3.bf16.xpose.msra.mxu0 %v934_v43  ;;  %v978_v45 = vpop.permute.xlu1 %977 }
 0x437   : > { %2570 = vmatprep.subr.bf16.mxu0 %v3406_v17  ;;  %v983_v47 = vsel %vm929_vm3, %v978_v45, 0 }
 0x43d   : > { %2567 = vmatmul.mubr.msk.bf16.vlgmr.msra.gmra.mrb[4].mxu0 %vm929_vm3, %v4048_v46 }
 0x43e   : > { %2571 = vmatpush3.bf16.xpose.msra.mxu0 %v983_v47  ;;  %2572 = vmatprep.mubr.msk.bf16.mxu0 %vm3407_vm2, %v3406_v17 }
 0x43f   : > { %2582 = vmatprep.subr.bf16.mxu0 %v3406_v17 }
 0x445   : > { %2573 = vmatmul.mubr.msk.bf16.vlgmr.msra.gmra.mrb[8].mxu0 %vm929_vm3, %v4056_v49 }
 0x446   : > { %2584 = vmatprep.mubr.msk.bf16.mxu0 %vm3407_vm2, %v3406_v17 }
 0x510   : > { %v970_v51 = vpop.f32.mrb[4].mxu0 }
 0x511   : > { %v971_v52 = vadd.f32 %v970_v51, %v4062_v50  ;;  %v2568_v53 = vpop.f32.mrb[5].mxu0 }
 0x512   : > { %v973_v54 = vpop.f32.mrb[6].mxu0 }
 0x513   : > { %v2569_v55 = vpop.f32.mrb[7].mxu0  ;;  %v1025_v56 = vsel %vm929_vm3, %v971_v52, -inf }
 0x514   : > { %1026 = vmax.xlane.f32.xlu1 %v1025_v56 }
 0x518   : > { %v1019_v57 = vpop.f32.mrb[8].mxu0 }
 0x519   : > { %v1020_v58 = vadd.f32 %v1019_v57, %v4062_v50  ;;  %v2574_v59 = vpop.f32.mrb[9].mxu0 }
 0x51a   : > { %v1022_v60 = vpop.f32.mrb[10].mxu0 }
 0x51b   : > { %v2575_v61 = vpop.f32.mrb[11].mxu0  ;;  %v1028_v62 = vsel %vm929_vm3, %v1020_v58, -inf }
 0x51c   : > { %1029 = vmax.xlane.f32.xlu0 %v1028_v62 }
 0x525   : > { %1098 = vrot.lane.b32.xlu1 %v4042_v40, %s3409_s21 }
 0x529   : > { %1149 = vrot.lane.b32.xlu1 %v4040_v37, %s3410_s25 }
 0x5a1   : > { %v1027_v63 = vpop.xlane.xlu1 %1026 }
 0x5a2   : > { %v1031_v0 = vsub.f32 %v971_v52, %v1027_v63 }
 0x5a4   : > { %v1033_v1 = vmul.f32 1.442695, %v1031_v0 }
 0x5a5   : > { %v1099_v4 = vpop.permute.xlu1 %1098 }
 0x5a6   : > { %2875 = vpow2.f32 %v1033_v1  ;;  %v1104_v5 = vsel %vm1054_vm4, %v1099_v4, 0 }
 0x5a7   : > { %2583 = vmatpush3.bf16.msra.mxu0 %v1104_v5 }
 0x5a8   : > { %2594 = vmatprep.subr.bf16.mxu0 %v3406_v17 }
 0x5a9   : > { %v1030_v6 = vpop.xlane.xlu0 %1029  ;;  %v1150_v14 = vpop.permute.xlu1 %1149 }
 0x5aa   : > { %v1032_v7 = vsub.f32 %v1020_v58, %v1030_v6  ;;  %v1155_v22 = vsel %vm929_vm3, %v1150_v14, 0 }
 0x5ac   : > { %v1035_v8 = vmul.f32 1.442695, %v1032_v7 }
 0x5ae   : > { %2877 = vpow2.f32 %v1035_v8 }
 0x5b0   : > { %v2876_v9 = vpop.eup %2875 }
 0x5b1   : > { %v1037_v10 = vsel %vm929_vm3, %v2876_v9, 0.0 }
 0x5b2   : > { %1038 = vadd.xlane.f32.xlu0 %v1037_v10 }
 0x5b8   : > { %v2878_v11 = vpop.eup %2877 }
 0x5b9   : > { %v1040_v12 = vsel %vm929_vm3, %v2878_v11, 0.0 }
 0x5ba   : > { %1041 = vadd.xlane.f32.xlu1 %v1040_v12 }
 0x5c8   : > { %1049 = vrot.lane.b32.xlu0 %v4040_v37, %s3409_s21 }
 0x5cb   : > { %1200 = vrot.lane.b32.xlu1 %v4042_v40, %s3410_s25 }
 0x5cc   : > { %1147 = vrot.lane.b32.xlu0 %v4048_v46, %s3411_s23 }
 0x5cf   : > { %1198 = vrot.lane.b32.xlu1 %v4056_v49, %s3411_s23 }
 0x63f   : > { %v1039_v13 = vpop.xlane.xlu0 %1038 }
 0x640   : > { %2879 = vrcp.f32 %v1039_v13 }
 0x643   : > { %v1050_v15 = vpop.permute.xlu0 %1049 }
 0x644   : > { %v1056_v16 = vsel %vm1054_vm4, %v1050_v15, 0 }
 0x645   : > { %2577 = vmatpush3.bf16.msra.mxu1 %v1056_v16 }
 0x646   : > { %2588 = vmatprep.subr.bf16.mxu1 %v3406_v17 }
 0x647   : > { %v1042_v18 = vpop.xlane.xlu1 %1041  ;;  %v1148_v27 = vpop.permute.xlu0 %1147 }
 0x648   : > { %2881 = vrcp.f32 %v1042_v18 }
 0x64a   : > { %v2880_v19 = vpop.eup %2879 }
 0x64b   : > { %v1045_v20 = vmul.f32 %v2880_v19, %v2876_v9  ;;  %v1201_v25 = vpop.permute.xlu1 %1200 }
 0x64c   : > { %v1206_v28 = vsel %vm929_vm3, %v1201_v25, 0 }
 0x64d   : > { %v1047_v21 = vpack.c.bf16 %v1045_v20, %v1045_v20 }
 0x64f   : > { %2579 = vmatmul.mubr.msk.bf16.vlgmr.msra.gmra.mrb[0].mxu1 %vm929_vm3, %v1047_v21  ;;  %v1199_v29 = vpop.permute.xlu1 %1198 }
 0x650   : > { %2589 = vmatpush3.bf16.xpose.msra.mxu1 %v1155_v22  ;;  %2590 = vmatprep.mubr.msk.bf16.mxu1 %vm3407_vm2, %v3406_v17 }
 0x651   : > { %2600 = vmatprep.subr.bf16.mxu1 %v3406_v17 }
 0x652   : > { %v2882_v23 = vpop.eup %2881 }
 0x653   : > { %v1046_v24 = vmul.f32 %v2882_v23, %v2878_v11 }
 0x655   : > { %v1048_v26 = vpack.c.bf16 %v1046_v24, %v1046_v24 }
 0x657   : > { %2585 = vmatmul.mubr.msk.bf16.vlgmr.msra.gmra.mrb[12].mxu0 %vm929_vm3, %v1048_v26  ;;  %2591 = vmatmul.mubr.msk.bf16.vlgmr.msra.gmra.mrb[4].mxu1 %vm929_vm3, %v1148_v27 }
 0x658   : > { %2595 = vmatpush3.bf16.xpose.msra.mxu0 %v1206_v28  ;;  %2596 = vmatprep.mubr.msk.bf16.mxu0 %vm3407_vm2, %v3406_v17 }
 0x659   : > { %2606 = vmatprep.subr.bf16.mxu0 %v3406_v17  ;;  %2602 = vmatprep.mubr.msk.bf16.mxu1 %vm3407_vm2, %v3406_v17 }
 0x65f   : > { %2597 = vmatmul.mubr.msk.bf16.vlgmr.msra.gmra.mrb[16].mxu0 %vm929_vm3, %v1199_v29 }
 0x660   : > { %2608 = vmatprep.mubr.msk.bf16.mxu0 %vm3407_vm2, %v3406_v17 }
 0x722   : > { %v4096_v30 = vpop.f32.mrb[0].mxu1 }
 0x723   : > { %v2580_v31 = vpop.f32.mrb[1].mxu1 }
 0x724   : > { %v1095_v32 = vpop.f32.mrb[2].mxu1 }
 0x725   : > { %v2581_v33 = vpop.f32.mrb[3].mxu1 }
 0x72a   : > { %v4098_v34 = vpop.f32.mrb[12].mxu0  ;;  %v1191_v35 = vpop.f32.mrb[4].mxu1 }
 0x72b   : > { %v1192_v36 = vadd.f32 %v1191_v35, %v4062_v50  ;;  %v2586_v38 = vpop.f32.mrb[13].mxu0  ;;  %v2592_v39 = vpop.f32.mrb[5].mxu1 }
 0x72c   : > { %v1143_v41 = vpop.f32.mrb[14].mxu0  ;;  %v1194_v42 = vpop.f32.mrb[6].mxu1 }
 0x72d   : > { %v2587_v43 = vpop.f32.mrb[15].mxu0  ;;  %v2593_v44 = vpop.f32.mrb[7].mxu1  ;;  %v1248_v45 = vsel %vm929_vm3, %v1192_v36, -inf }
 0x72e   : > { %1249 = vmax.xlane.f32.xlu0 %v1248_v45 }
 0x732   : > { %v1242_v47 = vpop.f32.mrb[16].mxu0 }
 0x733   : > { %v1243_v48 = vadd.f32 %v1242_v47, %v4062_v50  ;;  %v2598_v51 = vpop.f32.mrb[17].mxu0 }
 0x734   : > { %v1245_v52 = vpop.f32.mrb[18].mxu0 }
 0x735   : > { %v2599_v53 = vpop.f32.mrb[19].mxu0  ;;  %v1251_v54 = vsel %vm929_vm3, %v1243_v48, -inf }
 0x736   : > { %1252 = vmax.xlane.f32.xlu1 %v1251_v54 }
 0x747   : > { %1320 = vrot.lane.b32.xlu1 %v4042_v40, %s3412_s18 }
 0x74b   : > { %1370 = vrot.lane.b32.xlu1 %v4040_v37, %s3413_s28 }
 0x74f   : > { %1420 = vrot.lane.b32.xlu1 %v4042_v40, %s3413_s28 }
 0x753   : > { %1418 = vrot.lane.b32.xlu1 %v4056_v49, %s3414_s17 }
 0x7bb   : > { %v1250_v55 = vpop.xlane.xlu0 %1249 }
 0x7bc   : > { %v1254_v56 = vsub.f32 %v1192_v36, %v1250_v55 }
 0x7be   : > { %v1256_v57 = vmul.f32 1.442695, %v1254_v56 }
 0x7c0   : > { %2883 = vpow2.f32 %v1256_v57 }
 0x7c3   : > { %v1253_v58 = vpop.xlane.xlu1 %1252 }
 0x7c4   : > { %v1255_v59 = vsub.f32 %v1243_v48, %v1253_v58 }
 0x7c6   : > { %v1258_v60 = vmul.f32 1.442695, %v1255_v59 }
 0x7c7   : > { %v1321_v61 = vpop.permute.xlu1 %1320 }
 0x7c8   : > { %2885 = vpow2.f32 %v1258_v60  ;;  %v1326_v62 = vsel %vm1054_vm4, %v1321_v61, 0 }
 0x7c9   : > { %2607 = vmatpush3.bf16.msra.mxu0 %v1326_v62 }
 0x7ca   : > { %v2884_v63 = vpop.eup %2883  ;;  %2618 = vmatprep.subr.bf16.mxu0 %v3406_v17 }
 0x7cb   : > { %v1260_v0 = vsel %vm929_vm3, %v2884_v63, 0.0  ;;  %v1371_v12 = vpop.permute.xlu1 %1370 }
 0x7cc   : > { %1261 = vadd.xlane.f32.xlu0 %v1260_v0  ;;  %v1376_v16 = vsel %vm929_vm3, %v1371_v12, 0 }
 0x7cf   : > { %v1421_v15 = vpop.permute.xlu1 %1420 }
 0x7d0   : > { %v1426_v19 = vsel %vm929_vm3, %v1421_v15, 0 }
 0x7d2   : > { %v2886_v1 = vpop.eup %2885 }
 0x7d3   : > { %v1263_v4 = vsel %vm929_vm3, %v2886_v1, 0.0  ;;  %v1419_v21 = vpop.permute.xlu1 %1418 }
 0x7d4   : > { %1264 = vadd.xlane.f32.xlu0 %v1263_v4 }
 0x7ea   : > { %1272 = vrot.lane.b32.xlu0 %v4040_v37, %s3412_s18 }
 0x7ee   : > { %1368 = vrot.lane.b32.xlu0 %v4048_v46, %s3414_s17 }
 0x859   : > { %v1262_v5 = vpop.xlane.xlu0 %1261 }
 0x85a   : > { %2887 = vrcp.f32 %v1262_v5 }
 0x861   : > { %v1265_v6 = vpop.xlane.xlu0 %1264 }
 0x862   : > { %2889 = vrcp.f32 %v1265_v6 }
 0x864   : > { %v2888_v7 = vpop.eup %2887 }
 0x865   : > { %v1268_v8 = vmul.f32 %v2888_v7, %v2884_v63  ;;  %v1273_v9 = vpop.permute.xlu0 %1272 }
 0x866   : > { %v1278_v10 = vsel %vm1054_vm4, %v1273_v9, 0 }
 0x867   : > { %2601 = vmatpush3.bf16.msra.mxu1 %v1278_v10  ;;  %v1270_v11 = vpack.c.bf16 %v1268_v8, %v1268_v8 }
 0x868   : > { %2612 = vmatprep.subr.bf16.mxu1 %v3406_v17 }
 0x869   : > { %v1369_v20 = vpop.permute.xlu0 %1368 }
 0x86a   : > { %2603 = vmatmul.mubr.msk.bf16.vlgmr.msra.gmra.mrb[8].mxu1 %vm929_vm3, %v1270_v11 }
 0x86b   : > { %2614 = vmatprep.mubr.msk.bf16.mxu1 %vm3407_vm2, %v3406_v17 }
 0x86c   : > { %v2890_v13 = vpop.eup %2889 }
 0x86d   : > { %v1269_v14 = vmul.f32 %v2890_v13, %v2886_v1 }
 0x86f   : > { %v1271_v18 = vpack.c.bf16 %v1269_v14, %v1269_v14 }
 0x870   : > { %2613 = vmatpush3.bf16.xpose.msra.mxu1 %v1376_v16 }
 0x871   : > { %2609 = vmatmul.mubr.msk.bf16.vlgmr.msra.gmra.mrb[20].mxu0 %vm929_vm3, %v1271_v18  ;;  %2624 = vmatprep.subr.bf16.mxu1 %v3406_v17 }
 0x872   : > { %2619 = vmatpush3.bf16.xpose.msra.mxu0 %v1426_v19  ;;  %2620 = vmatprep.mubr.msk.bf16.mxu0 %vm3407_vm2, %v3406_v17 }
 0x873   : > { %2630 = vmatprep.subr.bf16.mxu0 %v3406_v17 }
 0x877   : > { %2615 = vmatmul.mubr.msk.bf16.vlgmr.msra.gmra.mrb[12].mxu1 %vm929_vm3, %v1369_v20 }
 0x878   : > { %2626 = vmatprep.mubr.msk.bf16.mxu1 %vm3407_vm2, %v3406_v17 }
 0x879   : > { %2621 = vmatmul.mubr.msk.bf16.vlgmr.msra.gmra.mrb[24].mxu0 %vm929_vm3, %v1419_v21 }
 0x87a   : > { %2632 = vmatprep.mubr.msk.bf16.mxu0 %vm3407_vm2, %v3406_v17 }
 0x93d   : > { %v4132_v22 = vpop.f32.mrb[8].mxu1 }
 0x93e   : > { %v2604_v23 = vpop.f32.mrb[9].mxu1 }
 0x93f   : > { %v1317_v24 = vpop.f32.mrb[10].mxu1 }
 0x940   : > { %v2605_v25 = vpop.f32.mrb[11].mxu1 }
 0x944   : > { %v4134_v26 = vpop.f32.mrb[20].mxu0 }
 0x945   : > { %v2840_v27 = vpack.i.bf16 %v4134_v26, %v4132_v22  ;;  %v2610_v28 = vpop.f32.mrb[21].mxu0 }
 0x946   : > { %v1365_v29 = vpop.f32.mrb[22].mxu0 }
 0x947   : > { %v2611_v31 = vpop.f32.mrb[23].mxu0 }
 0x94a   : > { %v1412_v32 = vpop.f32.mrb[12].mxu1 }
 0x94b   : > { %v1413_v33 = vadd.f32 %v1412_v32, %v4062_v50  ;;  %v2616_v35 = vpop.f32.mrb[13].mxu1 }
 0x94c   : > { %v1415_v36 = vpop.f32.mrb[14].mxu1  ;;  %v1462_v38 = vpop.f32.mrb[24].mxu0 }
 0x94d   : > { %v1463_v39 = vadd.f32 %v1462_v38, %v4062_v50  ;;  %v2617_v41 = vpop.f32.mrb[15].mxu1  ;;  %v2622_v42 = vpop.f32.mrb[25].mxu0  ;;  %v1468_v43 = vsel %vm929_vm3, %v1413_v33, -inf }
 0x94e   : > { %1469 = vmax.xlane.f32.xlu0 %v1468_v43  ;;  %v1465_v44 = vpop.f32.mrb[26].mxu0 }
 0x94f   : > { %v2623_v45 = vpop.f32.mrb[27].mxu0  ;;  %v1471_v47 = vsel %vm929_vm3, %v1463_v39, -inf }
 0x950   : > { %1472 = vmax.xlane.f32.xlu1 %v1471_v47 }
 0x961   : > { %1540 = vrot.lane.b32.xlu1 %v4042_v40, %s3415_s19 }
 0x965   : > { %1590 = vrot.lane.b32.xlu1 %v4040_v37, %s3416_s16 }
 0x969   : > { %1640 = vrot.lane.b32.xlu1 %v4042_v40, %s3416_s16 }
 0x96d   : > { %1638 = vrot.lane.b32.xlu1 %v4056_v49, %s3417_s15 }
 0x9db   : > { %v1470_v48 = vpop.xlane.xlu0 %1469 }
 0x9dc   : > { %v1474_v51 = vsub.f32 %v1413_v33, %v1470_v48 }
 0x9dd   : > { %v1473_v52 = vpop.xlane.xlu1 %1472 }
 0x9de   : > { %v1476_v53 = vmul.f32 1.442695, %v1474_v51  ;;  %v1475_v54 = vsub.f32 %v1463_v39, %v1473_v52 }
 0x9e0   : > { %2891 = vpow2.f32 %v1476_v53  ;;  %v1478_v55 = vmul.f32 1.442695, %v1475_v54 }
 0x9e1   : > { %v1541_v56 = vpop.permute.xlu1 %1540 }
 0x9e2   : > { %2893 = vpow2.f32 %v1478_v55  ;;  %v1546_v57 = vsel %vm1054_vm4, %v1541_v56, 0 }
 0x9e3   : > { %2631 = vmatpush3.bf16.msra.mxu0 %v1546_v57 }
 0x9e4   : > { %2642 = vmatprep.subr.bf16.mxu0 %v3406_v17 }
 0x9e5   : > { %v1591_v4 = vpop.permute.xlu1 %1590 }
 0x9e9   : > { %v1641_v9 = vpop.permute.xlu1 %1640 }
 0x9ea   : > { %v2892_v58 = vpop.eup %2891  ;;  %v1646_v11 = vsel %vm929_vm3, %v1641_v9, 0 }
 0x9eb   : > { %v1480_v59 = vsel %vm929_vm3, %v2892_v58, 0.0 }
 0x9ec   : > { %v2894_v60 = vpop.eup %2893  ;;  %1481 = vadd.xlane.f32.xlu0 %v1480_v59 }
 0x9ed   : > { %v1483_v49 = vsel %vm929_vm3, %v2894_v60, 0.0  ;;  %v1639_v13 = vpop.permute.xlu1 %1638 }
 0x9f0   : > { %1484 = vadd.xlane.f32.xlu0 %v1483_v49 }
 0xa06   : > { %1492 = vrot.lane.b32.xlu0 %v4040_v37, %s3415_s19 }
 0xa0a   : > { %1588 = vrot.lane.b32.xlu0 %v4048_v46, %s3417_s15  ;;  %v1596_v46 = vsel %vm929_vm3, %v1591_v4, 0 }
 0xa79   : > { %v1482_v61 = vpop.xlane.xlu0 %1481 }
 0xa7a   : > { %2895 = vrcp.f32 %v1482_v61  ;;  %v2859_v61 = vld [vmem:[%s671_s1] sm:$0xff]  }
 0xa7d   : > { %v1485_v62 = vpop.xlane.xlu0 %1484 }
 0xa7e   : > { %2897 = vrcp.f32 %v1485_v62  ;;  %v2860_v62 = vld [vmem:[%s671_s1 + $0x8] sm:$0xff]   ;;  %s3423_s1 = smov [#allocation23]  }
 0xa81   : > { %v1493_v63 = vpop.permute.xlu0 %1492 }
 0xa82   : > { %v1498_v0 = vsel %vm1054_vm4, %v1493_v63, 0  ;;  %v810_v63 = vld [vmem:[#allocation5] sm:$0xff] }
 0xa83   : > { %2625 = vmatpush3.bf16.msra.mxu1 %v1498_v0 }
 0xa84   : > { %v2896_v1 = vpop.eup %2895  ;;  %2636 = vmatprep.subr.bf16.mxu1 %v3406_v17 }
 0xa85   : > { %v1488_v5 = vmul.f32 %v2896_v1, %v2892_v58  ;;  %v1589_v12 = vpop.permute.xlu0 %1588  ;;  %v3421_v1 = vmov 0  }
 0xa86   : > { %2855 = vset.pattern.permute.xlu1 %v3421_v1  ;;  %2856 = vset.pattern.permute.xlu0 %v3421_v1 }
 0xa87   : > { %v1490_v6 = vpack.c.bf16 %v1488_v5, %v1488_v5 }
 0xa88   : > { %v2898_v7 = vpop.eup %2897 }
 0xa89   : > { %v1489_v8 = vmul.f32 %v2898_v7, %v2894_v60  ;;  %2627 = vmatmul.mubr.msk.bf16.vlgmr.msra.gmra.mrb[16].mxu1 %vm929_vm3, %v1490_v6 }
 0xa8a   : > { %2638 = vmatprep.mubr.msk.bf16.mxu1 %vm3407_vm2, %v3406_v17 }
 0xa8b   : > { %v1491_v10 = vpack.c.bf16 %v1489_v8, %v1489_v8 }
 0xa8c   : > { %2637 = vmatpush3.bf16.xpose.msra.mxu1 %v1596_v46 }
 0xa8d   : > { %2633 = vmatmul.mubr.msk.bf16.vlgmr.msra.gmra.mrb[28].mxu0 %vm929_vm3, %v1491_v10  ;;  %2648 = vmatprep.subr.bf16.mxu1 %v3406_v17 }
 0xa8e   : > { %2643 = vmatpush3.bf16.xpose.msra.mxu0 %v1646_v11  ;;  %2644 = vmatprep.mubr.msk.bf16.mxu0 %vm3407_vm2, %v3406_v17  ;;  %v811_v11 = vld [vmem:[#allocation5 + $0x8] sm:$0xff] }
 0xa8f   : > { %2654 = vmatprep.subr.bf16.mxu0 %v3406_v17 }
 0xa93   : > { %2639 = vmatmul.mubr.msk.bf16.vlgmr.msra.gmra.mrb[20].mxu1 %vm929_vm3, %v1589_v12 }
 0xa94   : > { %2650 = vmatprep.mubr.msk.bf16.mxu1 %vm3407_vm2, %v3406_v17 }
 0xa95   : > { %2645 = vmatmul.mubr.msk.bf16.vlgmr.msra.gmra.mrb[32].mxu0 %vm929_vm3, %v1639_v13 }
 0xa96   : > { %2656 = vmatprep.mubr.msk.bf16.mxu0 %vm3407_vm2, %v3406_v17 }
 0xb5c   : > { %v1534_v14 = vpop.f32.mrb[16].mxu1 }
 0xb5d   : > { %v2628_v15 = vpop.f32.mrb[17].mxu1 }
 0xb5e   : > { %v1537_v16 = vpop.f32.mrb[18].mxu1 }
 0xb5f   : > { %v2629_v18 = vpop.f32.mrb[19].mxu1 }
 0xb60   : > { %v1582_v19 = vpop.f32.mrb[28].mxu0 }
 0xb61   : > { %v2845_v20 = vpack.i.bf16 %v1582_v19, %v1534_v14  ;;  %v2634_v21 = vpop.f32.mrb[29].mxu0 }
 0xb62   : > { %v1585_v23 = vpop.f32.mrb[30].mxu0 }
 0xb63   : > { %v2635_v24 = vpop.f32.mrb[31].mxu0 }
 0xb66   : > { %v1632_v25 = vpop.f32.mrb[20].mxu1 }
 0xb67   : > { %v1633_v28 = vadd.f32 %v1632_v25, %v4062_v50  ;;  %v2640_v29 = vpop.f32.mrb[21].mxu1 }
 0xb68   : > { %v1635_v31 = vpop.f32.mrb[22].mxu1  ;;  %v1682_v32 = vpop.f32.mrb[32].mxu0 }
 0xb69   : > { %v1683_v33 = vadd.f32 %v1682_v32, %v4062_v50  ;;  %v2641_v35 = vpop.f32.mrb[23].mxu1  ;;  %v2646_v36 = vpop.f32.mrb[33].mxu0  ;;  %v1688_v38 = vsel %vm929_vm3, %v1633_v28, -inf }
 0xb6a   : > { %1689 = vmax.xlane.f32.xlu0 %v1688_v38  ;;  %v1685_v39 = vpop.f32.mrb[34].mxu0 }
 0xb6b   : > { %v2647_v41 = vpop.f32.mrb[35].mxu0  ;;  %v1691_v42 = vsel %vm929_vm3, %v1683_v33, -inf }
 0xb6c   : > { %1692 = vmax.xlane.f32.xlu1 %v1691_v42 }
 0xb7d   : > { %1760 = vrot.lane.b32.xlu1 %v4042_v40, %s3418_s13 }
 0xb81   : > { %2841 = vrot.lane.b32.xlu1 %v2840_v27, %s3419_s7 }
 0xb85   : > { %2846 = vrot.lane.b32.xlu1 %v2845_v20, %s3420_s10 }
 0xb89   : > { %1903 = vperm.xlu1 %2855, %v810_v63  }
 0xbf7   : > { %v1690_v50 = vpop.xlane.xlu0 %1689 }
 0xbf8   : > { %v1694_v43 = vsub.f32 %v1633_v28, %v1690_v50 }
 0xbf9   : > { %v1693_v44 = vpop.xlane.xlu1 %1692 }
 0xbfa   : > { %v1696_v45 = vmul.f32 1.442695, %v1694_v43  ;;  %v1695_v47 = vsub.f32 %v1683_v33, %v1693_v44 }
 0xbfc   : > { %2899 = vpow2.f32 %v1696_v45  ;;  %v1698_v48 = vmul.f32 1.442695, %v1695_v47 }
 0xbfd   : > { %v1761_v51 = vpop.permute.xlu1 %1760 }
 0xbfe   : > { %2901 = vpow2.f32 %v1698_v48  ;;  %v1766_v52 = vsel %vm1054_vm4, %v1761_v51, 0 }
 0xbff   : > { %2655 = vmatpush3.bf16.msra.mxu0 %v1766_v52 }
 0xc00   : > { %2668 = vmatprep.subr.bf16.mxu0 %v3406_v17 }
 0xc01   : > { %v2842_v12 = vpop.permute.xlu1 %2841 }
 0xc02   : > { %v2844_v14 = vunpack.i.h.bf16 %v2842_v12  ;;  %v2843_v15 = vunpack.i.l.bf16 %v2842_v12  ;;  %v2869_v12 = vld [vmem:[%s4000_s30 + $0x30] sm:$0xff]  }
 0xc04   : > { %v1833_v20 = vsel %vm929_vm3, %v4098_v34, %v2844_v14  ;;  %v1832_v21 = vsel %vm929_vm3, %v4096_v30, %v2843_v15  ;;  %v2485_v14 = vld [vmem:[%s704_s24] ss:$0 sm:$0xff] }
 0xc05   : > { %v2847_v13 = vpop.permute.xlu1 %2846 }
 0xc06   : > { %v2900_v40 = vpop.eup %2899  ;;  %v2849_v16 = vunpack.i.h.bf16 %v2847_v13  ;;  %v2848_v18 = vunpack.i.l.bf16 %v2847_v13  ;;  %v2870_v13 = vld [vmem:[%s4000_s30 + $0x38] sm:$0xff]  }
 0xc07   : > { %v1700_v22 = vsel %vm929_vm3, %v2900_v40, 0.0 }
 0xc08   : > { %v2902_v26 = vpop.eup %2901  ;;  %1701 = vadd.xlane.f32.xlu0 %v1700_v22  ;;  %v1835_v25 = vsel %vm1834_vm5, %v1832_v21, %v2848_v18  ;;  %v1836_v28 = vsel %vm1834_vm5, %v1833_v20, %v2849_v16 }
 0xc09   : > { %v1703_v27 = vsel %vm929_vm3, %v2902_v26, 0.0  ;;  %v1904_v33 = vpop.permute.xlu1 %1903 }
 0xc0c   : > { %1704 = vadd.xlane.f32.xlu0 %v1703_v27  ;;  %v2861_v27 = vld [vmem:[%s696_s26] sm:$0xff]  }
 0xc22   : > { %1712 = vrot.lane.b32.xlu0 %v4040_v37, %s3418_s13 }
 0xc95   : > { %v1702_v53 = vpop.xlane.xlu0 %1701 }
 0xc96   : > { %2903 = vrcp.f32 %v1702_v53  ;;  %v2862_v53 = vld [vmem:[%s696_s26 + $0x8] sm:$0xff]  }
 0xc99   : > { %v1705_v54 = vpop.xlane.xlu0 %1704 }
 0xc9a   : > { %2905 = vrcp.f32 %v1705_v54 }
 0xc9d   : > { %v1713_v55 = vpop.permute.xlu0 %1712 }
 0xc9e   : > { %v1718_v56 = vsel %vm1054_vm4, %v1713_v55, 0 }
 0xc9f   : > { %2649 = vmatpush3.bf16.msra.mxu1 %v1718_v56 }
 0xca0   : > { %v2904_v57 = vpop.eup %2903  ;;  %2660 = vmatprep.subr.bf16.mxu1 %v3406_v17 }
 0xca1   : > { %v1708_v58 = vmul.f32 %v2904_v57, %v2900_v40 }
 0xca3   : > { %v1710_v59 = vpack.c.bf16 %v1708_v58, %v1708_v58 }
 0xca4   : > { %v2906_v60 = vpop.eup %2905 }
 0xca5   : > { %v1709_v49 = vmul.f32 %v2906_v60, %v2902_v26  ;;  %2651 = vmatmul.mubr.msk.bf16.vlgmr.msra.gmra.mrb[24].mxu1 %vm929_vm3, %v1710_v59 }
 0xca6   : > { %2664 = vmatprep.mubr.msk.bf16.mxu1 %vm3407_vm2, %v3406_v17  ;;  %2661 = vmatpush3.bf16.msra.mxu1 %v2859_v61 }
 0xca7   : > { %v1711_v37 = vpack.c.bf16 %v1709_v49, %v1709_v49  ;;  %2662 = vmatprep.subr.bf16.mxu1 %v3406_v17  ;;  %v2483_v49 = vld [vmem:[%s679_s29] ss:$0 sm:$0xff]  ;;  %s2168_s29 = sshll.u32 %s3423_s1, 4  ;;  %s2169_s29 = int_to_ptr.vmem [resolvable:$true] %s2168_s29 }
 0xca8   : > { %s3299_s3 = scalar_lea.vmem %s2169_s29, 256  ;;  %p3306_p9 = scmp.lt.s32.totalorder %s2169_s29, %s2169_s29 }
 0xca9   : > { %2657 = vmatmul.mubr.msk.bf16.vlgmr.msra.gmra.mrb[36].mxu0 %vm929_vm3, %v1711_v37  ;;  %p3300_p12 = scmp.ne.s32.totalorder %s2169_s29, %s3299_s3  ;;  %p3307_p1 = scmp.lt.s32.totalorder %s3299_s3, %s3299_s3 }
 0xcaa   : > { %2672 = vmatprep.mubr.msk.bf16.mxu0 %vm3407_vm2, %v3406_v17  ;;  %2663 = vmatpush3.bf16.msra.mxu1 %v2860_v62 }
 0xcab   : > { %2676 = vmatprep.subr.bf16.mxu1 %v3406_v17  ;;  %2669 = vmatpush3.bf16.msra.mxu0 %v2861_v27  ;;  %p3301_p2 = pnand %p3300_p12, %p2780_p5  ;;  %p3308_p8 = por %p3307_p1, %p3306_p9 }
 0xcac   : > { %2670 = vmatprep.subr.bf16.mxu0 %v3406_v17 }
 0xcad   : > { %p3302_p6 = pneg %p3301_p2 }
 0xcaf   : > { %2671 = vmatpush3.bf16.msra.mxu0 %v2862_v53  ;;  %p3309_p13 = pnand %p3308_p8, %p3302_p6 }
 0xd78   : > { %v1754_v0 = vpop.f32.mrb[24].mxu1 }
 0xd79   : > { %v2652_v4 = vpop.f32.mrb[25].mxu1 }
 0xd7a   : > { %v1757_v5 = vpop.f32.mrb[26].mxu1 }
 0xd7b   : > { %v2653_v6 = vpop.f32.mrb[27].mxu1 }
 0xd7c   : > { %v1802_v7 = vpop.f32.mrb[36].mxu0 }
 0xd7d   : > { %v2850_v8 = vpack.i.bf16 %v1802_v7, %v1754_v0  ;;  %v2658_v9 = vpop.f32.mrb[37].mxu0  ;;  %v2484_v0 = vld [vmem:[%s687_s14] ss:$0 sm:$0xff]  ;;  %v2863_v7 = vld [vmem:[%s4000_s30] sm:$0xff]  }
 0xd7e   : > { %v1805_v46 = vpop.f32.mrb[38].mxu0  ;;  %v2865_v9 = vld [vmem:[%s4000_s30 + $0x10] sm:$0xff]  }
 0xd7f   : > { %2851 = vrot.lane.b32.xlu0 %v2850_v8, %s3422_s20  ;;  %v2659_v10 = vpop.f32.mrb[39].mxu0  ;;  %v2864_v8 = vld [vmem:[%s4000_s30 + $0x8] sm:$0xff]   ;;  %v2866_v46 = vld [vmem:[%s4000_s30 + $0x18] sm:$0xff]  }
 0xd80   : > { %v2867_v10 = vld [vmem:[%s4000_s30 + $0x20] sm:$0xff]  }
 0xd83   : > { %1908 = vperm.xlu0 %2856, %v811_v11   ;;  %v2868_v11 = vld [vmem:[%s4000_s30 + $0x28] sm:$0xff]  }
 0xdf1   : > { %v2852_v19 = vpop.permute.xlu0 %2851 }
 0xdf2   : > { %v2854_v23 = vunpack.i.h.bf16 %v2852_v19  ;;  %v2853_v24 = vunpack.i.l.bf16 %v2852_v19 }
 0xdf4   : > { %v1839_v29 = vsel %vm1837_vm6, %v1836_v28, %v2854_v23  ;;  %v1838_v31 = vsel %vm1837_vm6, %v1835_v25, %v2853_v24 }
 0xdf5   : > { %v1840_v32 = vpack.c.bf16 %v1839_v29, %v1838_v31 }
 0xdf7   : > { %2665 = vmatmul.mubr.msk.bf16.vlgmr.msra.gmra.mrb[28].mxu1 %vm815_vm1, %v1840_v32 }
 0xdf8   : > { %2692 = vmatprep.mubr.msk.bf16.mxu1 %vm3407_vm2, %v3406_v17  ;;  %2677 = vmatpush3.bf16.msra.mxu1 %v2863_v7 }
 0xdf9   : > { %2678 = vmatprep.subr.bf16.mxu1 %v3406_v17 }
 0xdfc   : > { %2679 = vmatpush3.bf16.msra.mxu1 %v2864_v8 }
 0xdfd   : > { %2680 = vmatprep.subr.bf16.mxu1 %v3406_v17 }
 0xe00   : > { %2681 = vmatpush3.bf16.msra.mxu1 %v2865_v9 }
 0xe01   : > { %2682 = vmatprep.subr.bf16.mxu1 %v3406_v17 }
 0xe02   : > { %v1909_v36 = vpop.permute.xlu0 %1908 }
 0xe04   : > { %2683 = vmatpush3.bf16.msra.mxu1 %v2866_v46 }
 0xe05   : > { %2684 = vmatprep.subr.bf16.mxu1 %v3406_v17 }
 0xe08   : > { %2685 = vmatpush3.bf16.msra.mxu1 %v2867_v10 }
 0xe09   : > { %2686 = vmatprep.subr.bf16.mxu1 %v3406_v17 }
 0xe0c   : > { %2687 = vmatpush3.bf16.msra.mxu1 %v2868_v11 }
 0xe0d   : > { %2688 = vmatprep.subr.bf16.mxu1 %v3406_v17 }
 0xe10   : > { %2689 = vmatpush3.bf16.msra.mxu1 %v2869_v12 }
 0xe11   : > { %2690 = vmatprep.subr.bf16.mxu1 %v3406_v17 }
 0xe14   : > { %2691 = vmatpush3.bf16.msra.mxu1 %v2870_v13 }
 0xeca   : > { %v1894_v35 = vpop.f32.mrb[28].mxu1 }
 0xecb   : > { %v1911_v38 = vmul.f32 %v1904_v33, %v1894_v35  ;;  %v2666_v34 = vpop.f32.mrb[29].mxu1 }
 0xecc   : > { %v1897_v39 = vpop.f32.mrb[30].mxu1 }
 0xecd   : > { %v4206_v30 = vadd.f32 %v1911_v38, %v4009_v2  ;;  %v1912_v41 = vmul.f32 %v1909_v36, %v1897_v39  ;;  %v2667_v42 = vpop.f32.mrb[31].mxu1 }
 0xecf   : > { %v4209_v50 = vadd.f32 %v1912_v41, %v4011_v3  ;;  %v1917_v43 = vsel %vm815_vm1, %v4206_v30, 0.0 }
 0xed0   : > { %1918 = vadd.xlane.f32.xlu1 %v1917_v43 }
 0xed1   : > { %v1920_v44 = vsel %vm815_vm1, %v4209_v50, 0.0 }
 0xed2   : > { %1921 = vadd.xlane.f32.xlu0 %v1920_v44 }
 0xf5d   : > { %v1919_v45 = vpop.xlane.xlu1 %1918 }
 0xf5e   : > { %v1923_v47 = vmul.f32 0.03125, %v1919_v45 }
 0xf5f   : > { %v1922_v48 = vpop.xlane.xlu0 %1921 }
 0xf60   : > { %v1925_v2 = vsub.f32 %v4206_v30, %v1923_v47  ;;  %v1924_v51 = vmul.f32 0.03125, %v1922_v48  ;;  %v2489_v47 = vld [vmem:[%s721_s27] ss:$0 sm:$0xff] }
 0xf62   : > { %v1926_v52 = vsub.f32 %v4209_v50, %v1924_v51  ;;  %v1927_v3 = vmul.f32 %v1925_v2, %v1925_v2 }
 0xf64   : > { %v1929_v40 = vsel %vm815_vm1, %v1927_v3, 0.0  ;;  %v1928_v22 = vmul.f32 %v1926_v52, %v1926_v52 }
 0xf65   : > { %1930 = vadd.xlane.f32.xlu0 %v1929_v40 }
 0xf66   : > { %v1932_v26 = vsel %vm815_vm1, %v1928_v22, 0.0 }
 0xf67   : > { %1933 = vadd.xlane.f32.xlu1 %v1932_v26 }
 0xff2   : > { %v1931_v54 = vpop.xlane.xlu0 %1930 }
 0xff3   : > { %v1935_v55 = vmul.f32 0.03125, %v1931_v54 }
 0xff4   : > { %v1934_v56 = vpop.xlane.xlu1 %1933 }
 0xff5   : > { %v1937_v57 = vadd.f32 1e-05, %v1935_v55  ;;  %v1936_v58 = vmul.f32 0.03125, %v1934_v56 }
 0xff7   : > { %2907 = vrsqrt.f32 %v1937_v57  ;;  %v1938_v59 = vadd.f32 1e-05, %v1936_v58 }
 0xff9   : > { %2909 = vrsqrt.f32 %v1938_v59 }
0x1001   : > { %v2908_v60 = vpop.eup %2907 }
0x1002   : > { %v1941_v37 = vmul.f32 %v2908_v60, %v1925_v2 }
0x1003   : > { %v2910_v61 = vpop.eup %2909 }
0x1004   : > { %v1949_v62 = vmul.f32 %v2483_v49, %v1941_v37  ;;  %v1942_v63 = vmul.f32 %v2910_v61, %v1926_v52 }
0x1006   : > { %v1950_v1 = vmul.f32 %v2483_v49, %v1942_v63  ;;  %v1957_v4 = vadd.f32 %v2484_v0, %v1949_v62 }
0x1008   : > { %v1958_v5 = vadd.f32 %v2484_v0, %v1950_v1 }
0x100a   : > { %v1959_v6 = vpack.c.bf16 %v1958_v5, %v1957_v4 }
0x100c   : > { %2673 = vmatmul.mubr.msk.bf16.vlgmr.msra.gmra.mrb[40].mxu0 %vm815_vm1, %v1959_v6 }
0x10df   : > { %v2020_v15 = vpop.f32.mrb[40].mxu0 }
0x10e0   : > { %v2021_v16 = vadd.f32 %v2485_v14, %v2020_v15  ;;  %v2674_v18 = vpop.f32.mrb[41].mxu0 }
0x10e1   : > { %v2023_v19 = vpop.f32.mrb[42].mxu0 }
0x10e2   : > { %v2029_v20 = vmul.f32 %v2021_v16, %v2021_v16  ;;  %v2024_v21 = vadd.f32 %v2485_v14, %v2023_v19  ;;  %v2675_v23 = vpop.f32.mrb[43].mxu0  ;;  %v2027_v39 = vmul.f32 0.5, %v2021_v16 }
0x10e4   : > { %v2031_v24 = vmul.f32 %v2029_v20, %v2021_v16  ;;  %v2030_v25 = vmul.f32 %v2024_v21, %v2024_v21  ;;  %v2028_v41 = vmul.f32 0.5, %v2024_v21 }
0x10e6   : > { %v2033_v28 = vmul.f32 0.044715, %v2031_v24  ;;  %v2032_v29 = vmul.f32 %v2030_v25, %v2024_v21 }
0x10e8   : > { %v2035_v31 = vadd.f32 %v2033_v28, %v2021_v16  ;;  %v2034_v32 = vmul.f32 0.044715, %v2032_v29 }
0x10ea   : > { %v2037_v33 = vmul.f32 0.7978846, %v2035_v31  ;;  %v2036_v35 = vadd.f32 %v2034_v32, %v2024_v21 }
0x10ec   : > { %2911 = vtanh.f32 %v2037_v33  ;;  %v2038_v17 = vmul.f32 0.7978846, %v2036_v35 }
0x10ee   : > { %2913 = vtanh.f32 %v2038_v17 }
0x10f6   : > { %v2912_v36 = vpop.eup %2911 }
0x10f7   : > { %v2041_v38 = vadd.f32 1.0, %v2912_v36 }
0x10f8   : > { %v2914_v34 = vpop.eup %2913 }
0x10f9   : > { %v2042_v42 = vadd.f32 1.0, %v2914_v34  ;;  %v2043_v43 = vmul.f32 %v2041_v38, %v2027_v39 }
0x10fb   : > { %v2044_v44 = vmul.f32 %v2042_v42, %v2028_v41 }
0x10fd   : > { %v2045_v45 = vpack.c.bf16 %v2044_v44, %v2043_v43 }
0x10ff   : > { %2693 = vmatmul.mubr.bf16.vlgmr.msra.gmra.mrb[32].mxu1 %v2045_v45 }
0x11d2   : > { %v2151_v48 = vpop.f32.mrb[32].mxu1 }
0x11d3   : > { %v2152_v2 = vadd.f32 %v2489_v47, %v2151_v48  ;;  %v2694_v51 = vpop.f32.mrb[33].mxu1 }
0x11d4   : > { %v2154_v52 = vpop.f32.mrb[34].mxu1 }
0x11d5   : > { %v2158_v3 = vadd.f32 %v2152_v2, %v4206_v30  ;;  %v2155_v40 = vadd.f32 %v2489_v47, %v2154_v52  ;;  %v2695_v22 = vpop.f32.mrb[35].mxu1 }
0x11d7   : > { %2160 = vst.msk [vmem:[#allocation23] sm:$0xff] %vm815_vm1, %v2158_v3  ;;  %v2159_v26 = vadd.f32 %v2155_v40, %v4209_v50 }
0x11d9   : > { %2161 = vst.msk [vmem:[#allocation23 + $0x8] sm:$0xff] %vm815_vm1, %v2159_v26 }
0x11da   : > { %3312 = shalt.err (!%p3309_p13)
}
0x11db   : > { %s4394_s24 = sld [smem:[#allocation46_spill]] }
0x11e1   : > { %s3313_s30 = scalar_lea.hbm %s4394_s24, 256 }
0x11e2   : > { %p3314_p0 = scmp.ne.s32.totalorder %s4394_s24, %s3313_s30  ;;  %p3319_p7 = scmp.lt.u32.totalorder %s3313_s30, %s4394_s24 }
0x11e4   : > { %p3315_p3 = pnand %p3314_p0, %p2780_p5 }
0x11e6   : > { %p3316_p11 = pneg %p3315_p3 }
0x11e8   : > { %p3321_p10 = pnand %p3319_p7, %p3316_p11 }
0x11ea   : > { %3324 = shalt.err (!%p3321_p10)
}
0x11eb   : > { %s3424_s23 = smov 128  }
0x11ec   : > { %2729 = dma.vmem_to_hbm [thread:$0]  (%p2780_p5), %s2169_s29, 256, %s4394_s24, [#allocation4], %s3424_s23, %s3424_s23, %s3419_s7  }
0x11ed   : > { %3370 = dma.done.wait (%p2780_p5), [#allocation4], 256  }
0x11ee   : > { %3372 = vsyncadd (%p2780_p5), [#allocation4], 4294967040 }
0x11ef PF: > { %s4395_s28 = sld [smem:[#allocation35_spill]]  ;;  %s4396_s25 = sld [smem:[#allocation32_spill]] }
0x11f0   : > { %s4397_s26 = sld [smem:[#allocation33_spill]]  ;;  %s4398_s27 = sld [smem:[#allocation36_spill]] }
0x11f5   : > { %p38_p4 = scmp.ge.s32.totalorder %s4395_s28, 4  }
0x11f7   :  { %40 = sbr.rel (!%p38_p4) target bundleno = 23 (0x17), region = 233 }
0x11fe   :  { %2184 = vsyncpa [#allocation3], 1 }
0x11ff   :  { %2186 = vsyncpa [#allocation3 + $0x1], 1 }
0x1200   :  { %2187 = vsyncpa [#allocation6], 1 }
0x1201   :  { %2188 = vsyncpa [#allocation9], 1 }
0x1202   :  { %2190 = vsyncpa [#allocation9 + $0x1], 1 }
0x1203   :  { %2191 = vsyncpa [#allocation12], 1 }
0x1204   :  { %2193 = vsyncpa [#allocation12 + $0x1], 1 }
0x1205   :  { %2194 = vsyncpa [#allocation15], 1 }
0x1206   :  { %2196 = vsyncpa [#allocation15 + $0x1], 1 }
0x1207   :  { %2197 = vsyncpa [#allocation18], 1 }
0x1208   :  { %2199 = vsyncpa [#allocation18 + $0x1], 1 }
0x1209   :  { %2200 = vsyncpa [#allocation21], 1 }
0x120a   :  { %2202 = vsyncpa [#allocation21 + $0x1], 1 }
0x120b   :  { %2203 = vsyncpa [#allocation4], 1 }
0x120c   :  { %2205 = vsyncpa [#allocation4 + $0x1], 1 }

</bundles_post_ra>
